<compile_context>
chip_gen: v7x
topology: tpu7x:2x2x1
jax: 0.10.0
libtpu: 0.0.40
codegen_flags: <defaults>
</compile_context>

<pallas_src>
import jax
import jax.numpy as jnp
from jax.experimental import pallas as pl
from jax.experimental.pallas import tpu as pltpu


# ------------------------------ fused kernel ------------------------------- #

def _lenet_kernel(x_ref, w1e_ref, w1o_ref, b1_ref, w2e_ref, w2o_ref, b2_ref,
                  wfc1_ref, bfc1_ref, wfc2_ref, bfc2_ref, wout_ref, bout_ref,
                  o_ref, wp1_ref, p1_ref, wp2_ref, p2f_ref):
    f32, bf16 = jnp.float32, jnp.bfloat16
    TB = x_ref.shape[0]

    # ---- conv1: Conv2d(1, 6, 5) on 28x28 -> 24x24 via banded MXU matmuls.
    # acc1e[b*24+y, m*6+co] = conv1(no bias)[b, co, y, 2m]; acc1o -> x = 2m+1.
    acc1e = acc1o = None
    for i in range(5):
        lhs = x_ref[:, i:i + 24, :].astype(bf16).reshape(TB * 24, 28)
        pe = jnp.dot(lhs, w1e_ref[i], preferred_element_type=f32)
        po = jnp.dot(lhs, w1o_ref[i], preferred_element_type=f32)
        acc1e = pe if acc1e is None else acc1e + pe
        acc1o = po if acc1o is None else acc1o + po

    # ---- pool1 (2x2) + bias + ReLU.  W direction: elementwise max of the two
    # parity accumulators; H direction: stride-2 sublane loads from scratch.
    wp1_ref[...] = jnp.maximum(acc1e, acc1o).reshape(TB, 24, 72)
    p1 = jnp.maximum(wp1_ref[:, pl.ds(0, 12, 2), :],
                     wp1_ref[:, pl.ds(1, 12, 2), :])
    p1_ref[...] = jnp.maximum(p1 + b1_ref[...], 0.0)          # [TB,12,72], w*6+ci

    # ---- conv2: Conv2d(6, 16, 5) on 12x12 -> 8x8 via banded MXU matmuls.
    # acc2e[b*8+y, m*16+co] = conv2(no bias)[b, co, y, 2m]; acc2o -> x = 2m+1.
    acc2e = acc2o = None
    for i in range(5):
        lhs = p1_ref[:, i:i + 8, :].astype(bf16).reshape(TB * 8, 72)
        pe = jnp.dot(lhs, w2e_ref[i], preferred_element_type=f32)
        po = jnp.dot(lhs, w2o_ref[i], preferred_element_type=f32)
        acc2e = pe if acc2e is None else acc2e + pe
        acc2o = po if acc2o is None else acc2o + po

    # ---- pool2 (2x2) + bias + ReLU, then flatten to [TB, 256] in torch CHW order
    # (the matching permutation is baked into wfc1 by the wrapper).
    wp2_ref[...] = jnp.maximum(acc2e, acc2o).reshape(TB, 8, 64)
    p2 = jnp.maximum(wp2_ref[:, pl.ds(0, 4, 2), :],
                     wp2_ref[:, pl.ds(1, 4, 2), :])
    p2 = jnp.maximum(p2 + b2_ref[...], 0.0)                    # [TB,4,64], w*16+co
    for h in range(4):
        p2f_ref[:, 64 * h:64 * (h + 1)] = p2[:, h, :]

    # ---- fc1: Linear(256, 120) + ReLU (single K=256 matmul)
    a = jnp.dot(p2f_ref[...].astype(bf16), wfc1_ref[...], preferred_element_type=f32)
    a = jnp.maximum(a + bfc1_ref[...], 0.0)
    # ---- fc2: Linear(120, 84) + ReLU
    a = jnp.dot(a.astype(bf16), wfc2_ref[...], preferred_element_type=f32)
    a = jnp.maximum(a + bfc2_ref[...], 0.0)
    # TODO(synk): Dropout(p=0.2) implemented as inference-mode identity (no training RNG).
    # ---- out: Linear(84, out_features), lane-padded to 128
    o_ref[...] = (jnp.dot(a.astype(bf16), wout_ref[...], preferred_element_type=f32)
                  + bout_ref[...])


# --------------------------- wrapper & weight prep -------------------------- #

def _banded_conv_weights(params):
    """Build banded (Toeplitz) weight matrices turning both convs into matmuls."""
    f32 = jnp.float32
    # conv1 taps [i, j, co]  (cin = 1)
    w1t = params["w1"].transpose(2, 3, 1, 0)[:, :, 0, :]            # (5, 5, 6)
    w1e = jnp.zeros((5, 28, 72), f32)
    w1o = jnp.zeros((5, 28, 72), f32)
    for m in range(12):                                              # output x = 2m / 2m+1
        w1e = w1e.at[:, 2 * m:2 * m + 5, 6 * m:6 * m + 6].set(w1t)
        w1o = w1o.at[:, 2 * m + 1:2 * m + 6, 6 * m:6 * m + 6].set(w1t)
    # conv2 taps [i, j*6+ci, co]
    w2t = params["w2"].transpose(2, 3, 1, 0).reshape(5, 30, 16)      # (5, 30, 16)
    w2e = jnp.zeros((5, 72, 64), f32)
    w2o = jnp.zeros((5, 72, 64), f32)
    for m in range(4):                                               # output x = 2m / 2m+1
        w2e = w2e.at[:, 12 * m:12 * m + 30, 16 * m:16 * m + 16].set(w2t)
        w2o = w2o.at[:, 12 * m + 6:12 * m + 36, 16 * m:16 * m + 16].set(w2t)
    return w1e, w1o, w2e, w2o


@jax.jit
def lenet_forward(params, x):
    """x: [B, 1, 28, 28] float32 -> [B, out_features] float32."""
    B = x.shape[0]
    nf = params["wout"].shape[1]
    NF = max(128, ((nf + 127) // 128) * 128)          # lane-dense padded output width

    # Batch tile (sized for the smallest VMEM generation, v7x: 64 MiB phys / 32 MiB scoped)
    TB = B if B <= 16 else 16
    Bp = ((B + TB - 1) // TB) * TB

    x3 = x.reshape(B, 28, 28)
    if Bp != B:
        x3 = jnp.pad(x3, ((0, Bp - B), (0, 0), (0, 0)))

    bf16 = jnp.bfloat16
    w1e, w1o, w2e, w2o = (w.astype(bf16) for w in _banded_conv_weights(params))
    b1t = jnp.tile(params["b1"], 12).reshape(1, 72)                  # [m*6+co]
    b2t = jnp.tile(params["b2"], 4).reshape(1, 64)                   # [m*16+co]
    # fc1 weight permuted so row index = h*64 + w*16 + co matches the kernel's flatten.
    wfc1 = (params["wfc1"].reshape(16, 4, 4, 120).transpose(1, 2, 0, 3)
            .reshape(256, 120).astype(bf16))
    bfc1 = params["bfc1"].reshape(1, 120)
    wfc2 = params["wfc2"].astype(bf16)
    bfc2 = params["bfc2"].reshape(1, 84)
    wout = jnp.zeros((84, NF), jnp.float32).at[:, :nf].set(params["wout"]).astype(bf16)
    bout = jnp.zeros((1, NF), jnp.float32).at[:, :nf].set(params["bout"].reshape(1, nf))

    def fixed(shape):
        nd = len(shape)
        return pl.BlockSpec(shape, lambda i, _nd=nd: (0,) * _nd)     # VMEM-resident weight

    out = pl.pallas_call(
        _lenet_kernel,
        grid=(Bp // TB,),
        in_specs=[
            pl.BlockSpec((TB, 28, 28), lambda i: (i, 0, 0)),         # input, batch-tiled
            fixed((5, 28, 72)), fixed((5, 28, 72)), fixed((1, 72)),  # conv1
            fixed((5, 72, 64)), fixed((5, 72, 64)), fixed((1, 64)),  # conv2
            fixed((256, 120)), fixed((1, 120)),                      # fc1
            fixed((120, 84)), fixed((1, 84)),                        # fc2
            fixed((84, NF)), fixed((1, NF)),                         # out (lane padded)
        ],
        out_specs=pl.BlockSpec((TB, NF), lambda i: (i, 0)),
        out_shape=jax.ShapeDtypeStruct((Bp, NF), jnp.float32),
        scratch_shapes=[
            pltpu.VMEM((TB, 24, 72), jnp.float32),   # conv1 W-pooled (pre H-pool)
            pltpu.VMEM((TB, 12, 72), jnp.float32),   # pooled1
            pltpu.VMEM((TB, 8, 64), jnp.float32),    # conv2 W-pooled (pre H-pool)
            pltpu.VMEM((TB, 256), jnp.float32),      # pooled2, flattened (CHW order)
        ],
        compiler_params=pltpu.CompilerParams(
            dimension_semantics=("parallel",),
            vmem_limit_bytes=32 * 1024 * 1024,
        ),
    )(x3, w1e, w1o, b1t, w2e, w2o, b2t, wfc1, bfc1, wfc2, bfc2, wout, bout)
    return out[:B, :nf]


# --------------------------- reference & params ----------------------------- #

def lenet_reference(params, x):
    """Pure-JAX (XLA) reference mirroring the PyTorch module semantics."""
    def conv(x, w, b):
        y = jax.lax.conv_general_dilated(
            x, w, (1, 1), "VALID", dimension_numbers=("NCHW", "OIHW", "NCHW"))
        return y + b.reshape(1, -1, 1, 1)

    def pool(x):
        return jax.lax.reduce_window(x, -jnp.inf, jax.lax.max,
                                     (1, 1, 2, 2), (1, 1, 2, 2), "VALID")

    y = conv(x, params["w1"], params["b1"])
    y = jnp.maximum(pool(y), 0.0)
    y = conv(y, params["w2"], params["b2"])
    y = jnp.maximum(pool(y), 0.0)
    y = y.reshape(y.shape[0], -1)                       # torch Flatten (C, H, W order)
    y = jnp.maximum(y @ params["wfc1"] + params["bfc1"], 0.0)
    y = jnp.maximum(y @ params["wfc2"] + params["bfc2"], 0.0)
    return y @ params["wout"] + params["bout"]


def init_params(key, out_features=10):
    """Deterministic synthetic parameters matching nn.Module shapes (mnist=True -> dim=4)."""
    ks = jax.random.split(key, 10)
    s = 0.1
    return {
        "w1":   jax.random.normal(ks[0], (6, 1, 5, 5), jnp.float32) * s,    # Conv2d(1, 6, 5)
        "b1":   jax.random.normal(ks[1], (6,), jnp.float32) * s,
        "w2":   jax.random.normal(ks[2], (16, 6, 5, 5), jnp.float32) * s,   # Conv2d(6, 16, 5)
        "b2":   jax.random.normal(ks[3], (16,), jnp.float32) * s,
        "wfc1": jax.random.normal(ks[4], (16 * 4 * 4, 120), jnp.float32) * s,   # Linear(256,120)
        "bfc1": jax.random.normal(ks[5], (120,), jnp.float32) * s,
        "wfc2": jax.random.normal(ks[6], (120, 84), jnp.float32) * s,           # Linear(120,84)
        "bfc2": jax.random.normal(ks[7], (84,), jnp.float32) * s,
        "wout": jax.random.normal(ks[8], (84, out_features), jnp.float32) * s,  # Linear(84,out)
        "bout": jax.random.normal(ks[9], (out_features,), jnp.float32) * s,
    }


if __name__ == "__main__":
    key = jax.random.PRNGKey(0)
    pkey, xkey = jax.random.split(key)
    params = init_params(pkey, out_features=10)
    # MNIST-sized NCHW input (28x28 so the flatten yields 16*4*4 = 256 features).
    x = jax.random.normal(xkey, (2, 1, 28, 28), jnp.float32)

    y = lenet_forward(params, x)
    jax.block_until_ready(y)

    y_ref = lenet_reference(params, x)
    assert y.shape == (2, 10) and y.dtype == jnp.float32
    assert bool(jnp.allclose(y, y_ref, rtol=3e-2, atol=3e-2)), (y, y_ref)
    print("KERNEL_OK")
</pallas_src>

<mosaic_0001>
module attributes {stable_mosaic.version = 11 : i64} {
  func.func @_lenet_kernel(%arg0: i32, %arg1: memref<2x28x28xf32, #tpu.memory_space<vmem>>, %arg2: memref<5x28x72xbf16, #tpu.memory_space<vmem>>, %arg3: memref<5x28x72xbf16, #tpu.memory_space<vmem>>, %arg4: memref<1x72xf32, #tpu.memory_space<vmem>>, %arg5: memref<5x72x64xbf16, #tpu.memory_space<vmem>>, %arg6: memref<5x72x64xbf16, #tpu.memory_space<vmem>>, %arg7: memref<1x64xf32, #tpu.memory_space<vmem>>, %arg8: memref<256x120xbf16, #tpu.memory_space<vmem>>, %arg9: memref<1x120xf32, #tpu.memory_space<vmem>>, %arg10: memref<120x84xbf16, #tpu.memory_space<vmem>>, %arg11: memref<1x84xf32, #tpu.memory_space<vmem>>, %arg12: memref<84x128xbf16, #tpu.memory_space<vmem>>, %arg13: memref<1x128xf32, #tpu.memory_space<vmem>>, %arg14: memref<2x128xf32, #tpu.memory_space<vmem>>, %arg15: memref<2x24x72xf32, #tpu.memory_space<vmem>>, %arg16: memref<2x12x72xf32, #tpu.memory_space<vmem>>, %arg17: memref<2x8x64xf32, #tpu.memory_space<vmem>>, %arg18: memref<2x256xf32, #tpu.memory_space<vmem>>) attributes {dimension_semantics = [#tpu.dimension_semantics<parallel>], iteration_bounds = array<i64: 1>, scalar_prefetch = 0 : i64, scratch_operands = 4 : i64, tpu.core_type = #tpu.core_type<tc>, window_params = [{transform_indices = @transform_0, window_bounds = array<i64: 2, 28, 28>}, {pipeline_mode = #tpu.pipeline_mode<synchronous>, transform_indices = @transform_1, window_bounds = array<i64: 5, 28, 72>}, {pipeline_mode = #tpu.pipeline_mode<synchronous>, transform_indices = @transform_2, window_bounds = array<i64: 5, 28, 72>}, {pipeline_mode = #tpu.pipeline_mode<synchronous>, transform_indices = @transform_3, window_bounds = array<i64: 1, 72>}, {pipeline_mode = #tpu.pipeline_mode<synchronous>, transform_indices = @transform_4, window_bounds = array<i64: 5, 72, 64>}, {pipeline_mode = #tpu.pipeline_mode<synchronous>, transform_indices = @transform_5, window_bounds = array<i64: 5, 72, 64>}, {pipeline_mode = #tpu.pipeline_mode<synchronous>, transform_indices = @transform_6, window_bounds = array<i64: 1, 64>}, {pipeline_mode = #tpu.pipeline_mode<synchronous>, transform_indices = @transform_7, window_bounds = array<i64: 256, 120>}, {pipeline_mode = #tpu.pipeline_mode<synchronous>, transform_indices = @transform_8, window_bounds = array<i64: 1, 120>}, {pipeline_mode = #tpu.pipeline_mode<synchronous>, transform_indices = @transform_9, window_bounds = array<i64: 120, 84>}, {pipeline_mode = #tpu.pipeline_mode<synchronous>, transform_indices = @transform_10, window_bounds = array<i64: 1, 84>}, {pipeline_mode = #tpu.pipeline_mode<synchronous>, transform_indices = @transform_11, window_bounds = array<i64: 84, 128>}, {pipeline_mode = #tpu.pipeline_mode<synchronous>, transform_indices = @transform_12, window_bounds = array<i64: 1, 128>}, {transform_indices = @transform_13, window_bounds = array<i64: 2, 128>}]} {
    %c0 = arith.constant 0 : index
    %c0_0 = arith.constant 0 : index
    %c0_1 = arith.constant 0 : index
    %0 = vector.load %arg1[%c0, %c0_0, %c0_1] : memref<2x28x28xf32, #tpu.memory_space<vmem>>, vector<2x24x28xf32>
    %1 = arith.truncf %0 : vector<2x24x28xf32> to vector<2x24x28xbf16>
    %2 = vector.shape_cast %1 : vector<2x24x28xbf16> to vector<48x28xbf16>
    %c0_2 = arith.constant 0 : index
    %c0_3 = arith.constant 0 : index
    %c0_4 = arith.constant 0 : index
    %3 = vector.load %arg2[%c0_2, %c0_3, %c0_4] : memref<5x28x72xbf16, #tpu.memory_space<vmem>>, vector<1x28x72xbf16>
    %4 = vector.shape_cast %3 : vector<1x28x72xbf16> to vector<28x72xbf16>
    %cst = arith.constant dense<0.000000e+00> : vector<48x72xf32>
    %5 = tpu.matmul %2, %4, %cst {dimension_numbers = #tpu.dot_dimension_numbers<[1], [0], [0], [1], [0, 0, 1, 1], [], []>} : vector<48x28xbf16>, vector<28x72xbf16>, vector<48x72xf32> -> vector<48x72xf32>
    %c0_5 = arith.constant 0 : index
    %c0_6 = arith.constant 0 : index
    %c0_7 = arith.constant 0 : index
    %6 = vector.load %arg3[%c0_5, %c0_6, %c0_7] : memref<5x28x72xbf16, #tpu.memory_space<vmem>>, vector<1x28x72xbf16>
    %7 = vector.shape_cast %6 : vector<1x28x72xbf16> to vector<28x72xbf16>
    %cst_8 = arith.constant dense<0.000000e+00> : vector<48x72xf32>
    %8 = tpu.matmul %2, %7, %cst_8 {dimension_numbers = #tpu.dot_dimension_numbers<[1], [0], [0], [1], [0, 0, 1, 1], [], []>} : vector<48x28xbf16>, vector<28x72xbf16>, vector<48x72xf32> -> vector<48x72xf32>
    %c0_9 = arith.constant 0 : index
    %c1 = arith.constant 1 : index
    %c0_10 = arith.constant 0 : index
    %9 = vector.load %arg1[%c0_9, %c1, %c0_10] : memref<2x28x28xf32, #tpu.memory_space<vmem>>, vector<2x24x28xf32>
    %10 = arith.truncf %9 : vector<2x24x28xf32> to vector<2x24x28xbf16>
    %11 = vector.shape_cast %10 : vector<2x24x28xbf16> to vector<48x28xbf16>
    %c1_11 = arith.constant 1 : index
    %c0_12 = arith.constant 0 : index
    %c0_13 = arith.constant 0 : index
    %12 = vector.load %arg2[%c1_11, %c0_12, %c0_13] : memref<5x28x72xbf16, #tpu.memory_space<vmem>>, vector<1x28x72xbf16>
    %13 = vector.shape_cast %12 : vector<1x28x72xbf16> to vector<28x72xbf16>
    %cst_14 = arith.constant dense<0.000000e+00> : vector<48x72xf32>
    %14 = tpu.matmul %11, %13, %cst_14 {dimension_numbers = #tpu.dot_dimension_numbers<[1], [0], [0], [1], [0, 0, 1, 1], [], []>} : vector<48x28xbf16>, vector<28x72xbf16>, vector<48x72xf32> -> vector<48x72xf32>
    %c1_15 = arith.constant 1 : index
    %c0_16 = arith.constant 0 : index
    %c0_17 = arith.constant 0 : index
    %15 = vector.load %arg3[%c1_15, %c0_16, %c0_17] : memref<5x28x72xbf16, #tpu.memory_space<vmem>>, vector<1x28x72xbf16>
    %16 = vector.shape_cast %15 : vector<1x28x72xbf16> to vector<28x72xbf16>
    %cst_18 = arith.constant dense<0.000000e+00> : vector<48x72xf32>
    %17 = tpu.matmul %11, %16, %cst_18 {dimension_numbers = #tpu.dot_dimension_numbers<[1], [0], [0], [1], [0, 0, 1, 1], [], []>} : vector<48x28xbf16>, vector<28x72xbf16>, vector<48x72xf32> -> vector<48x72xf32>
    %18 = arith.addf %5, %14 : vector<48x72xf32>
    %19 = arith.addf %8, %17 : vector<48x72xf32>
    %c0_19 = arith.constant 0 : index
    %c2 = arith.constant 2 : index
    %c0_20 = arith.constant 0 : index
    %20 = vector.load %arg1[%c0_19, %c2, %c0_20] : memref<2x28x28xf32, #tpu.memory_space<vmem>>, vector<2x24x28xf32>
    %21 = arith.truncf %20 : vector<2x24x28xf32> to vector<2x24x28xbf16>
    %22 = vector.shape_cast %21 : vector<2x24x28xbf16> to vector<48x28xbf16>
    %c2_21 = arith.constant 2 : index
    %c0_22 = arith.constant 0 : index
    %c0_23 = arith.constant 0 : index
    %23 = vector.load %arg2[%c2_21, %c0_22, %c0_23] : memref<5x28x72xbf16, #tpu.memory_space<vmem>>, vector<1x28x72xbf16>
    %24 = vector.shape_cast %23 : vector<1x28x72xbf16> to vector<28x72xbf16>
    %cst_24 = arith.constant dense<0.000000e+00> : vector<48x72xf32>
    %25 = tpu.matmul %22, %24, %cst_24 {dimension_numbers = #tpu.dot_dimension_numbers<[1], [0], [0], [1], [0, 0, 1, 1], [], []>} : vector<48x28xbf16>, vector<28x72xbf16>, vector<48x72xf32> -> vector<48x72xf32>
    %c2_25 = arith.constant 2 : index
    %c0_26 = arith.constant 0 : index
    %c0_27 = arith.constant 0 : index
    %26 = vector.load %arg3[%c2_25, %c0_26, %c0_27] : memref<5x28x72xbf16, #tpu.memory_space<vmem>>, vector<1x28x72xbf16>
    %27 = vector.shape_cast %26 : vector<1x28x72xbf16> to vector<28x72xbf16>
    %cst_28 = arith.constant dense<0.000000e+00> : vector<48x72xf32>
    %28 = tpu.matmul %22, %27, %cst_28 {dimension_numbers = #tpu.dot_dimension_numbers<[1], [0], [0], [1], [0, 0, 1, 1], [], []>} : vector<48x28xbf16>, vector<28x72xbf16>, vector<48x72xf32> -> vector<48x72xf32>
    %29 = arith.addf %18, %25 : vector<48x72xf32>
    %30 = arith.addf %19, %28 : vector<48x72xf32>
    %c0_29 = arith.constant 0 : index
    %c3 = arith.constant 3 : index
    %c0_30 = arith.constant 0 : index
    %31 = vector.load %arg1[%c0_29, %c3, %c0_30] : memref<2x28x28xf32, #tpu.memory_space<vmem>>, vector<2x24x28xf32>
    %32 = arith.truncf %31 : vector<2x24x28xf32> to vector<2x24x28xbf16>
    %33 = vector.shape_cast %32 : vector<2x24x28xbf16> to vector<48x28xbf16>
    %c3_31 = arith.constant 3 : index
    %c0_32 = arith.constant 0 : index
    %c0_33 = arith.constant 0 : index
    %34 = vector.load %arg2[%c3_31, %c0_32, %c0_33] : memref<5x28x72xbf16, #tpu.memory_space<vmem>>, vector<1x28x72xbf16>
    %35 = vector.shape_cast %34 : vector<1x28x72xbf16> to vector<28x72xbf16>
    %cst_34 = arith.constant dense<0.000000e+00> : vector<48x72xf32>
    %36 = tpu.matmul %33, %35, %cst_34 {dimension_numbers = #tpu.dot_dimension_numbers<[1], [0], [0], [1], [0, 0, 1, 1], [], []>} : vector<48x28xbf16>, vector<28x72xbf16>, vector<48x72xf32> -> vector<48x72xf32>
    %c3_35 = arith.constant 3 : index
    %c0_36 = arith.constant 0 : index
    %c0_37 = arith.constant 0 : index
    %37 = vector.load %arg3[%c3_35, %c0_36, %c0_37] : memref<5x28x72xbf16, #tpu.memory_space<vmem>>, vector<1x28x72xbf16>
    %38 = vector.shape_cast %37 : vector<1x28x72xbf16> to vector<28x72xbf16>
    %cst_38 = arith.constant dense<0.000000e+00> : vector<48x72xf32>
    %39 = tpu.matmul %33, %38, %cst_38 {dimension_numbers = #tpu.dot_dimension_numbers<[1], [0], [0], [1], [0, 0, 1, 1], [], []>} : vector<48x28xbf16>, vector<28x72xbf16>, vector<48x72xf32> -> vector<48x72xf32>
    %40 = arith.addf %29, %36 : vector<48x72xf32>
    %41 = arith.addf %30, %39 : vector<48x72xf32>
    %c0_39 = arith.constant 0 : index
    %c4 = arith.constant 4 : index
    %c0_40 = arith.constant 0 : index
    %42 = vector.load %arg1[%c0_39, %c4, %c0_40] : memref<2x28x28xf32, #tpu.memory_space<vmem>>, vector<2x24x28xf32>
    %43 = arith.truncf %42 : vector<2x24x28xf32> to vector<2x24x28xbf16>
    %44 = vector.shape_cast %43 : vector<2x24x28xbf16> to vector<48x28xbf16>
    %c4_41 = arith.constant 4 : index
    %c0_42 = arith.constant 0 : index
    %c0_43 = arith.constant 0 : index
    %45 = vector.load %arg2[%c4_41, %c0_42, %c0_43] : memref<5x28x72xbf16, #tpu.memory_space<vmem>>, vector<1x28x72xbf16>
    %46 = vector.shape_cast %45 : vector<1x28x72xbf16> to vector<28x72xbf16>
    %cst_44 = arith.constant dense<0.000000e+00> : vector<48x72xf32>
    %47 = tpu.matmul %44, %46, %cst_44 {dimension_numbers = #tpu.dot_dimension_numbers<[1], [0], [0], [1], [0, 0, 1, 1], [], []>} : vector<48x28xbf16>, vector<28x72xbf16>, vector<48x72xf32> -> vector<48x72xf32>
    %c4_45 = arith.constant 4 : index
    %c0_46 = arith.constant 0 : index
    %c0_47 = arith.constant 0 : index
    %48 = vector.load %arg3[%c4_45, %c0_46, %c0_47] : memref<5x28x72xbf16, #tpu.memory_space<vmem>>, vector<1x28x72xbf16>
    %49 = vector.shape_cast %48 : vector<1x28x72xbf16> to vector<28x72xbf16>
    %cst_48 = arith.constant dense<0.000000e+00> : vector<48x72xf32>
    %50 = tpu.matmul %44, %49, %cst_48 {dimension_numbers = #tpu.dot_dimension_numbers<[1], [0], [0], [1], [0, 0, 1, 1], [], []>} : vector<48x28xbf16>, vector<28x72xbf16>, vector<48x72xf32> -> vector<48x72xf32>
    %51 = arith.addf %40, %47 : vector<48x72xf32>
    %52 = arith.addf %41, %50 : vector<48x72xf32>
    %53 = arith.maximumf %51, %52 : vector<48x72xf32>
    %54 = vector.shape_cast %53 : vector<48x72xf32> to vector<2x24x72xf32>
    %c0_49 = arith.constant 0 : index
    %c0_50 = arith.constant 0 : index
    %c0_51 = arith.constant 0 : index
    %55 = vector.load %arg15[%c0_49, %c0_50, %c0_51] : memref<2x24x72xf32, #tpu.memory_space<vmem>>, vector<2x24x72xf32>
    tpu.vector_store %arg15[%c0_49, %c0_50, %c0_51], %54 {strides = array<i32>} : memref<2x24x72xf32, #tpu.memory_space<vmem>>, vector<2x24x72xf32>,
    %c0_52 = arith.constant 0 : index
    %c0_53 = arith.constant 0 : index
    %c0_54 = arith.constant 0 : index
    %56 = tpu.strided_load %arg15[%c0_52, %c0_53, %c0_54] {strides = array<i32: 1, 2, 1>} : memref<2x24x72xf32, #tpu.memory_space<vmem>>, vector<2x12x72xf32>
    %c0_55 = arith.constant 0 : index
    %c1_56 = arith.constant 1 : index
    %c0_57 = arith.constant 0 : index
    %57 = tpu.strided_load %arg15[%c0_55, %c1_56, %c0_57] {strides = array<i32: 1, 2, 1>} : memref<2x24x72xf32, #tpu.memory_space<vmem>>, vector<2x12x72xf32>
    %58 = arith.maximumf %56, %57 : vector<2x12x72xf32>
    %c0_58 = arith.constant 0 : index
    %c0_59 = arith.constant 0 : index
    %59 = vector.load %arg4[%c0_58, %c0_59] : memref<1x72xf32, #tpu.memory_space<vmem>>, vector<1x72xf32>
    %60 = vector.shape_cast %59 : vector<1x72xf32> to vector<1x1x72xf32>
    %61 = vector.broadcast %60 : vector<1x1x72xf32> to vector<2x12x72xf32>
    %62 = arith.addf %58, %61 : vector<2x12x72xf32>
    %cst_60 = arith.constant 0.000000e+00 : f32
    %63 = vector.broadcast %cst_60 : f32 to vector<2x12x72xf32>
    %64 = arith.maximumf %62, %63 : vector<2x12x72xf32>
    %c0_61 = arith.constant 0 : index
    %c0_62 = arith.constant 0 : index
    %c0_63 = arith.constant 0 : index
    %65 = vector.load %arg16[%c0_61, %c0_62, %c0_63] : memref<2x12x72xf32, #tpu.memory_space<vmem>>, vector<2x12x72xf32>
    tpu.vector_store %arg16[%c0_61, %c0_62, %c0_63], %64 {strides = array<i32>} : memref<2x12x72xf32, #tpu.memory_space<vmem>>, vector<2x12x72xf32>,
    %c0_64 = arith.constant 0 : index
    %c0_65 = arith.constant 0 : index
    %c0_66 = arith.constant 0 : index
    %66 = vector.load %arg16[%c0_64, %c0_65, %c0_66] : memref<2x12x72xf32, #tpu.memory_space<vmem>>, vector<2x8x72xf32>
    %67 = arith.truncf %66 : vector<2x8x72xf32> to vector<2x8x72xbf16>
    %68 = vector.shape_cast %67 : vector<2x8x72xbf16> to vector<16x72xbf16>
    %c0_67 = arith.constant 0 : index
    %c0_68 = arith.constant 0 : index
    %c0_69 = arith.constant 0 : index
    %69 = vector.load %arg5[%c0_67, %c0_68, %c0_69] : memref<5x72x64xbf16, #tpu.memory_space<vmem>>, vector<1x72x64xbf16>
    %70 = vector.shape_cast %69 : vector<1x72x64xbf16> to vector<72x64xbf16>
    %cst_70 = arith.constant dense<0.000000e+00> : vector<16x64xf32>
    %71 = tpu.matmul %68, %70, %cst_70 {dimension_numbers = #tpu.dot_dimension_numbers<[1], [0], [0], [1], [0, 0, 1, 1], [], []>} : vector<16x72xbf16>, vector<72x64xbf16>, vector<16x64xf32> -> vector<16x64xf32>
    %c0_71 = arith.constant 0 : index
    %c0_72 = arith.constant 0 : index
    %c0_73 = arith.constant 0 : index
    %72 = vector.load %arg6[%c0_71, %c0_72, %c0_73] : memref<5x72x64xbf16, #tpu.memory_space<vmem>>, vector<1x72x64xbf16>
    %73 = vector.shape_cast %72 : vector<1x72x64xbf16> to vector<72x64xbf16>
    %cst_74 = arith.constant dense<0.000000e+00> : vector<16x64xf32>
    %74 = tpu.matmul %68, %73, %cst_74 {dimension_numbers = #tpu.dot_dimension_numbers<[1], [0], [0], [1], [0, 0, 1, 1], [], []>} : vector<16x72xbf16>, vector<72x64xbf16>, vector<16x64xf32> -> vector<16x64xf32>
    %c0_75 = arith.constant 0 : index
    %c1_76 = arith.constant 1 : index
    %c0_77 = arith.constant 0 : index
    %75 = vector.load %arg16[%c0_75, %c1_76, %c0_77] : memref<2x12x72xf32, #tpu.memory_space<vmem>>, vector<2x8x72xf32>
    %76 = arith.truncf %75 : vector<2x8x72xf32> to vector<2x8x72xbf16>
    %77 = vector.shape_cast %76 : vector<2x8x72xbf16> to vector<16x72xbf16>
    %c1_78 = arith.constant 1 : index
    %c0_79 = arith.constant 0 : index
    %c0_80 = arith.constant 0 : index
    %78 = vector.load %arg5[%c1_78, %c0_79, %c0_80] : memref<5x72x64xbf16, #tpu.memory_space<vmem>>, vector<1x72x64xbf16>
    %79 = vector.shape_cast %78 : vector<1x72x64xbf16> to vector<72x64xbf16>
    %cst_81 = arith.constant dense<0.000000e+00> : vector<16x64xf32>
    %80 = tpu.matmul %77, %79, %cst_81 {dimension_numbers = #tpu.dot_dimension_numbers<[1], [0], [0], [1], [0, 0, 1, 1], [], []>} : vector<16x72xbf16>, vector<72x64xbf16>, vector<16x64xf32> -> vector<16x64xf32>
    %c1_82 = arith.constant 1 : index
    %c0_83 = arith.constant 0 : index
    %c0_84 = arith.constant 0 : index
    %81 = vector.load %arg6[%c1_82, %c0_83, %c0_84] : memref<5x72x64xbf16, #tpu.memory_space<vmem>>, vector<1x72x64xbf16>
    %82 = vector.shape_cast %81 : vector<1x72x64xbf16> to vector<72x64xbf16>
    %cst_85 = arith.constant dense<0.000000e+00> : vector<16x64xf32>
    %83 = tpu.matmul %77, %82, %cst_85 {dimension_numbers = #tpu.dot_dimension_numbers<[1], [0], [0], [1], [0, 0, 1, 1], [], []>} : vector<16x72xbf16>, vector<72x64xbf16>, vector<16x64xf32> -> vector<16x64xf32>
    %84 = arith.addf %71, %80 : vector<16x64xf32>
    %85 = arith.addf %74, %83 : vector<16x64xf32>
    %c0_86 = arith.constant 0 : index
    %c2_87 = arith.constant 2 : index
    %c0_88 = arith.constant 0 : index
    %86 = vector.load %arg16[%c0_86, %c2_87, %c0_88] : memref<2x12x72xf32, #tpu.memory_space<vmem>>, vector<2x8x72xf32>
    %87 = arith.truncf %86 : vector<2x8x72xf32> to vector<2x8x72xbf16>
    %88 = vector.shape_cast %87 : vector<2x8x72xbf16> to vector<16x72xbf16>
    %c2_89 = arith.constant 2 : index
    %c0_90 = arith.constant 0 : index
    %c0_91 = arith.constant 0 : index
    %89 = vector.load %arg5[%c2_89, %c0_90, %c0_91] : memref<5x72x64xbf16, #tpu.memory_space<vmem>>, vector<1x72x64xbf16>
    %90 = vector.shape_cast %89 : vector<1x72x64xbf16> to vector<72x64xbf16>
    %cst_92 = arith.constant dense<0.000000e+00> : vector<16x64xf32>
    %91 = tpu.matmul %88, %90, %cst_92 {dimension_numbers = #tpu.dot_dimension_numbers<[1], [0], [0], [1], [0, 0, 1, 1], [], []>} : vector<16x72xbf16>, vector<72x64xbf16>, vector<16x64xf32> -> vector<16x64xf32>
    %c2_93 = arith.constant 2 : index
    %c0_94 = arith.constant 0 : index
    %c0_95 = arith.constant 0 : index
    %92 = vector.load %arg6[%c2_93, %c0_94, %c0_95] : memref<5x72x64xbf16, #tpu.memory_space<vmem>>, vector<1x72x64xbf16>
    %93 = vector.shape_cast %92 : vector<1x72x64xbf16> to vector<72x64xbf16>
    %cst_96 = arith.constant dense<0.000000e+00> : vector<16x64xf32>
    %94 = tpu.matmul %88, %93, %cst_96 {dimension_numbers = #tpu.dot_dimension_numbers<[1], [0], [0], [1], [0, 0, 1, 1], [], []>} : vector<16x72xbf16>, vector<72x64xbf16>, vector<16x64xf32> -> vector<16x64xf32>
    %95 = arith.addf %84, %91 : vector<16x64xf32>
    %96 = arith.addf %85, %94 : vector<16x64xf32>
    %c0_97 = arith.constant 0 : index
    %c3_98 = arith.constant 3 : index
    %c0_99 = arith.constant 0 : index
    %97 = vector.load %arg16[%c0_97, %c3_98, %c0_99] : memref<2x12x72xf32, #tpu.memory_space<vmem>>, vector<2x8x72xf32>
    %98 = arith.truncf %97 : vector<2x8x72xf32> to vector<2x8x72xbf16>
    %99 = vector.shape_cast %98 : vector<2x8x72xbf16> to vector<16x72xbf16>
    %c3_100 = arith.constant 3 : index
    %c0_101 = arith.constant 0 : index
    %c0_102 = arith.constant 0 : index
    %100 = vector.load %arg5[%c3_100, %c0_101, %c0_102] : memref<5x72x64xbf16, #tpu.memory_space<vmem>>, vector<1x72x64xbf16>
    %101 = vector.shape_cast %100 : vector<1x72x64xbf16> to vector<72x64xbf16>
    %cst_103 = arith.constant dense<0.000000e+00> : vector<16x64xf32>
    %102 = tpu.matmul %99, %101, %cst_103 {dimension_numbers = #tpu.dot_dimension_numbers<[1], [0], [0], [1], [0, 0, 1, 1], [], []>} : vector<16x72xbf16>, vector<72x64xbf16>, vector<16x64xf32> -> vector<16x64xf32>
    %c3_104 = arith.constant 3 : index
    %c0_105 = arith.constant 0 : index
    %c0_106 = arith.constant 0 : index
    %103 = vector.load %arg6[%c3_104, %c0_105, %c0_106] : memref<5x72x64xbf16, #tpu.memory_space<vmem>>, vector<1x72x64xbf16>
    %104 = vector.shape_cast %103 : vector<1x72x64xbf16> to vector<72x64xbf16>
    %cst_107 = arith.constant dense<0.000000e+00> : vector<16x64xf32>
    %105 = tpu.matmul %99, %104, %cst_107 {dimension_numbers = #tpu.dot_dimension_numbers<[1], [0], [0], [1], [0, 0, 1, 1], [], []>} : vector<16x72xbf16>, vector<72x64xbf16>, vector<16x64xf32> -> vector<16x64xf32>
    %106 = arith.addf %95, %102 : vector<16x64xf32>
    %107 = arith.addf %96, %105 : vector<16x64xf32>
    %c0_108 = arith.constant 0 : index
    %c4_109 = arith.constant 4 : index
    %c0_110 = arith.constant 0 : index
    %108 = vector.load %arg16[%c0_108, %c4_109, %c0_110] : memref<2x12x72xf32, #tpu.memory_space<vmem>>, vector<2x8x72xf32>
    %109 = arith.truncf %108 : vector<2x8x72xf32> to vector<2x8x72xbf16>
    %110 = vector.shape_cast %109 : vector<2x8x72xbf16> to vector<16x72xbf16>
    %c4_111 = arith.constant 4 : index
    %c0_112 = arith.constant 0 : index
    %c0_113 = arith.constant 0 : index
    %111 = vector.load %arg5[%c4_111, %c0_112, %c0_113] : memref<5x72x64xbf16, #tpu.memory_space<vmem>>, vector<1x72x64xbf16>
    %112 = vector.shape_cast %111 : vector<1x72x64xbf16> to vector<72x64xbf16>
    %cst_114 = arith.constant dense<0.000000e+00> : vector<16x64xf32>
    %113 = tpu.matmul %110, %112, %cst_114 {dimension_numbers = #tpu.dot_dimension_numbers<[1], [0], [0], [1], [0, 0, 1, 1], [], []>} : vector<16x72xbf16>, vector<72x64xbf16>, vector<16x64xf32> -> vector<16x64xf32>
    %c4_115 = arith.constant 4 : index
    %c0_116 = arith.constant 0 : index
    %c0_117 = arith.constant 0 : index
    %114 = vector.load %arg6[%c4_115, %c0_116, %c0_117] : memref<5x72x64xbf16, #tpu.memory_space<vmem>>, vector<1x72x64xbf16>
    %115 = vector.shape_cast %114 : vector<1x72x64xbf16> to vector<72x64xbf16>
    %cst_118 = arith.constant dense<0.000000e+00> : vector<16x64xf32>
    %116 = tpu.matmul %110, %115, %cst_118 {dimension_numbers = #tpu.dot_dimension_numbers<[1], [0], [0], [1], [0, 0, 1, 1], [], []>} : vector<16x72xbf16>, vector<72x64xbf16>, vector<16x64xf32> -> vector<16x64xf32>
    %117 = arith.addf %106, %113 : vector<16x64xf32>
    %118 = arith.addf %107, %116 : vector<16x64xf32>
    %119 = arith.maximumf %117, %118 : vector<16x64xf32>
    %120 = vector.shape_cast %119 : vector<16x64xf32> to vector<2x8x64xf32>
    %c0_119 = arith.constant 0 : index
    %c0_120 = arith.constant 0 : index
    %c0_121 = arith.constant 0 : index
    %121 = vector.load %arg17[%c0_119, %c0_120, %c0_121] : memref<2x8x64xf32, #tpu.memory_space<vmem>>, vector<2x8x64xf32>
    tpu.vector_store %arg17[%c0_119, %c0_120, %c0_121], %120 {strides = array<i32>} : memref<2x8x64xf32, #tpu.memory_space<vmem>>, vector<2x8x64xf32>,
    %c0_122 = arith.constant 0 : index
    %c0_123 = arith.constant 0 : index
    %c0_124 = arith.constant 0 : index
    %122 = tpu.strided_load %arg17[%c0_122, %c0_123, %c0_124] {strides = array<i32: 1, 2, 1>} : memref<2x8x64xf32, #tpu.memory_space<vmem>>, vector<2x4x64xf32>
    %c0_125 = arith.constant 0 : index
    %c1_126 = arith.constant 1 : index
    %c0_127 = arith.constant 0 : index
    %123 = tpu.strided_load %arg17[%c0_125, %c1_126, %c0_127] {strides = array<i32: 1, 2, 1>} : memref<2x8x64xf32, #tpu.memory_space<vmem>>, vector<2x4x64xf32>
    %124 = arith.maximumf %122, %123 : vector<2x4x64xf32>
    %c0_128 = arith.constant 0 : index
    %c0_129 = arith.constant 0 : index
    %125 = vector.load %arg7[%c0_128, %c0_129] : memref<1x64xf32, #tpu.memory_space<vmem>>, vector<1x64xf32>
    %126 = vector.shape_cast %125 : vector<1x64xf32> to vector<1x1x64xf32>
    %127 = vector.broadcast %126 : vector<1x1x64xf32> to vector<2x4x64xf32>
    %128 = arith.addf %124, %127 : vector<2x4x64xf32>
    %cst_130 = arith.constant 0.000000e+00 : f32
    %129 = vector.broadcast %cst_130 : f32 to vector<2x4x64xf32>
    %130 = arith.maximumf %128, %129 : vector<2x4x64xf32>
    %131 = vector.extract_strided_slice %130 {offsets = [0, 0, 0], sizes = [2, 1, 64], strides = [1, 1, 1]} : vector<2x4x64xf32> to vector<2x1x64xf32>
    %132 = vector.shape_cast %131 : vector<2x1x64xf32> to vector<2x64xf32>
    %c0_131 = arith.constant 0 : index
    %c0_132 = arith.constant 0 : index
    %133 = vector.load %arg18[%c0_131, %c0_132] : memref<2x256xf32, #tpu.memory_space<vmem>>, vector<2x64xf32>
    tpu.vector_store %arg18[%c0_131, %c0_132], %132 {strides = array<i32>} : memref<2x256xf32, #tpu.memory_space<vmem>>, vector<2x64xf32>,
    %134 = vector.extract_strided_slice %130 {offsets = [0, 1, 0], sizes = [2, 1, 64], strides = [1, 1, 1]} : vector<2x4x64xf32> to vector<2x1x64xf32>
    %135 = vector.shape_cast %134 : vector<2x1x64xf32> to vector<2x64xf32>
    %c0_133 = arith.constant 0 : index
    %c64 = arith.constant 64 : index
    %136 = vector.load %arg18[%c0_133, %c64] : memref<2x256xf32, #tpu.memory_space<vmem>>, vector<2x64xf32>
    tpu.vector_store %arg18[%c0_133, %c64], %135 {strides = array<i32>} : memref<2x256xf32, #tpu.memory_space<vmem>>, vector<2x64xf32>,
    %137 = vector.extract_strided_slice %130 {offsets = [0, 2, 0], sizes = [2, 1, 64], strides = [1, 1, 1]} : vector<2x4x64xf32> to vector<2x1x64xf32>
    %138 = vector.shape_cast %137 : vector<2x1x64xf32> to vector<2x64xf32>
    %c0_134 = arith.constant 0 : index
    %c128 = arith.constant 128 : index
    %139 = vector.load %arg18[%c0_134, %c128] : memref<2x256xf32, #tpu.memory_space<vmem>>, vector<2x64xf32>
    tpu.vector_store %arg18[%c0_134, %c128], %138 {strides = array<i32>} : memref<2x256xf32, #tpu.memory_space<vmem>>, vector<2x64xf32>,
    %140 = vector.extract_strided_slice %130 {offsets = [0, 3, 0], sizes = [2, 1, 64], strides = [1, 1, 1]} : vector<2x4x64xf32> to vector<2x1x64xf32>
    %141 = vector.shape_cast %140 : vector<2x1x64xf32> to vector<2x64xf32>
    %c0_135 = arith.constant 0 : index
    %c192 = arith.constant 192 : index
    %142 = vector.load %arg18[%c0_135, %c192] : memref<2x256xf32, #tpu.memory_space<vmem>>, vector<2x64xf32>
    tpu.vector_store %arg18[%c0_135, %c192], %141 {strides = array<i32>} : memref<2x256xf32, #tpu.memory_space<vmem>>, vector<2x64xf32>,
    %c0_136 = arith.constant 0 : index
    %c0_137 = arith.constant 0 : index
    %143 = vector.load %arg18[%c0_136, %c0_137] : memref<2x256xf32, #tpu.memory_space<vmem>>, vector<2x256xf32>
    %144 = arith.truncf %143 : vector<2x256xf32> to vector<2x256xbf16>
    %c0_138 = arith.constant 0 : index
    %c0_139 = arith.constant 0 : index
    %145 = vector.load %arg8[%c0_138, %c0_139] : memref<256x120xbf16, #tpu.memory_space<vmem>>, vector<256x120xbf16>
    %cst_140 = arith.constant dense<0.000000e+00> : vector<2x120xf32>
    %146 = tpu.matmul %144, %145, %cst_140 {dimension_numbers = #tpu.dot_dimension_numbers<[1], [0], [0], [1], [0, 0, 1, 1], [], []>} : vector<2x256xbf16>, vector<256x120xbf16>, vector<2x120xf32> -> vector<2x120xf32>
    %c0_141 = arith.constant 0 : index
    %c0_142 = arith.constant 0 : index
    %147 = vector.load %arg9[%c0_141, %c0_142] : memref<1x120xf32, #tpu.memory_space<vmem>>, vector<1x120xf32>
    %148 = vector.broadcast %147 : vector<1x120xf32> to vector<2x120xf32>
    %149 = arith.addf %146, %148 : vector<2x120xf32>
    %cst_143 = arith.constant 0.000000e+00 : f32
    %150 = vector.broadcast %cst_143 : f32 to vector<2x120xf32>
    %151 = arith.maximumf %149, %150 : vector<2x120xf32>
    %152 = arith.truncf %151 : vector<2x120xf32> to vector<2x120xbf16>
    %c0_144 = arith.constant 0 : index
    %c0_145 = arith.constant 0 : index
    %153 = vector.load %arg10[%c0_144, %c0_145] : memref<120x84xbf16, #tpu.memory_space<vmem>>, vector<120x84xbf16>
    %cst_146 = arith.constant dense<0.000000e+00> : vector<2x84xf32>
    %154 = tpu.matmul %152, %153, %cst_146 {dimension_numbers = #tpu.dot_dimension_numbers<[1], [0], [0], [1], [0, 0, 1, 1], [], []>} : vector<2x120xbf16>, vector<120x84xbf16>, vector<2x84xf32> -> vector<2x84xf32>
    %c0_147 = arith.constant 0 : index
    %c0_148 = arith.constant 0 : index
    %155 = vector.load %arg11[%c0_147, %c0_148] : memref<1x84xf32, #tpu.memory_space<vmem>>, vector<1x84xf32>
    %156 = vector.broadcast %155 : vector<1x84xf32> to vector<2x84xf32>
    %157 = arith.addf %154, %156 : vector<2x84xf32>
    %cst_149 = arith.constant 0.000000e+00 : f32
    %158 = vector.broadcast %cst_149 : f32 to vector<2x84xf32>
    %159 = arith.maximumf %157, %158 : vector<2x84xf32>
    %160 = arith.truncf %159 : vector<2x84xf32> to vector<2x84xbf16>
    %c0_150 = arith.constant 0 : index
    %c0_151 = arith.constant 0 : index
    %161 = vector.load %arg12[%c0_150, %c0_151] : memref<84x128xbf16, #tpu.memory_space<vmem>>, vector<84x128xbf16>
    %cst_152 = arith.constant dense<0.000000e+00> : vector<2x128xf32>
    %162 = tpu.matmul %160, %161, %cst_152 {dimension_numbers = #tpu.dot_dimension_numbers<[1], [0], [0], [1], [0, 0, 1, 1], [], []>} : vector<2x84xbf16>, vector<84x128xbf16>, vector<2x128xf32> -> vector<2x128xf32>
    %c0_153 = arith.constant 0 : index
    %c0_154 = arith.constant 0 : index
    %163 = vector.load %arg13[%c0_153, %c0_154] : memref<1x128xf32, #tpu.memory_space<vmem>>, vector<1x128xf32>
    %164 = vector.broadcast %163 : vector<1x128xf32> to vector<2x128xf32>
    %165 = arith.addf %162, %164 : vector<2x128xf32>
    %c0_155 = arith.constant 0 : index
    %c0_156 = arith.constant 0 : index
    %166 = vector.load %arg14[%c0_155, %c0_156] : memref<2x128xf32, #tpu.memory_space<vmem>>, vector<2x128xf32>
    tpu.vector_store %arg14[%c0_155, %c0_156], %165 {strides = array<i32>} : memref<2x128xf32, #tpu.memory_space<vmem>>, vector<2x128xf32>,
    return
  }
  func.func @transform_0(%arg0: i32) -> (i32, i32, i32) {
    %c0_i32 = arith.constant 0 : i32
    %c0_i32_0 = arith.constant 0 : i32
    %c0_i32_1 = arith.constant 0 : i32
    return %arg0, %c0_i32, %c0_i32_0 : i32, i32, i32
  }
  func.func @transform_1(%arg0: i32) -> (i32, i32, i32) {
    %c0_i32 = arith.constant 0 : i32
    %c0_i32_0 = arith.constant 0 : i32
    %c0_i32_1 = arith.constant 0 : i32
    %c0_i32_2 = arith.constant 0 : i32
    return %c0_i32, %c0_i32_0, %c0_i32_1 : i32, i32, i32
  }
  func.func @transform_2(%arg0: i32) -> (i32, i32, i32) {
    %c0_i32 = arith.constant 0 : i32
    %c0_i32_0 = arith.constant 0 : i32
    %c0_i32_1 = arith.constant 0 : i32
    %c0_i32_2 = arith.constant 0 : i32
    return %c0_i32, %c0_i32_0, %c0_i32_1 : i32, i32, i32
  }
  func.func @transform_3(%arg0: i32) -> (i32, i32) {
    %c0_i32 = arith.constant 0 : i32
    %c0_i32_0 = arith.constant 0 : i32
    %c0_i32_1 = arith.constant 0 : i32
    return %c0_i32, %c0_i32_0 : i32, i32
  }
  func.func @transform_4(%arg0: i32) -> (i32, i32, i32) {
    %c0_i32 = arith.constant 0 : i32
    %c0_i32_0 = arith.constant 0 : i32
    %c0_i32_1 = arith.constant 0 : i32
    %c0_i32_2 = arith.constant 0 : i32
    return %c0_i32, %c0_i32_0, %c0_i32_1 : i32, i32, i32
  }
  func.func @transform_5(%arg0: i32) -> (i32, i32, i32) {
    %c0_i32 = arith.constant 0 : i32
    %c0_i32_0 = arith.constant 0 : i32
    %c0_i32_1 = arith.constant 0 : i32
    %c0_i32_2 = arith.constant 0 : i32
    return %c0_i32, %c0_i32_0, %c0_i32_1 : i32, i32, i32
  }
  func.func @transform_6(%arg0: i32) -> (i32, i32) {
    %c0_i32 = arith.constant 0 : i32
    %c0_i32_0 = arith.constant 0 : i32
    %c0_i32_1 = arith.constant 0 : i32
    return %c0_i32, %c0_i32_0 : i32, i32
  }
  func.func @transform_7(%arg0: i32) -> (i32, i32) {
    %c0_i32 = arith.constant 0 : i32
    %c0_i32_0 = arith.constant 0 : i32
    %c0_i32_1 = arith.constant 0 : i32
    return %c0_i32, %c0_i32_0 : i32, i32
  }
  func.func @transform_8(%arg0: i32) -> (i32, i32) {
    %c0_i32 = arith.constant 0 : i32
    %c0_i32_0 = arith.constant 0 : i32
    %c0_i32_1 = arith.constant 0 : i32
    return %c0_i32, %c0_i32_0 : i32, i32
  }
  func.func @transform_9(%arg0: i32) -> (i32, i32) {
    %c0_i32 = arith.constant 0 : i32
    %c0_i32_0 = arith.constant 0 : i32
    %c0_i32_1 = arith.constant 0 : i32
    return %c0_i32, %c0_i32_0 : i32, i32
  }
  func.func @transform_10(%arg0: i32) -> (i32, i32) {
    %c0_i32 = arith.constant 0 : i32
    %c0_i32_0 = arith.constant 0 : i32
    %c0_i32_1 = arith.constant 0 : i32
    return %c0_i32, %c0_i32_0 : i32, i32
  }
  func.func @transform_11(%arg0: i32) -> (i32, i32) {
    %c0_i32 = arith.constant 0 : i32
    %c0_i32_0 = arith.constant 0 : i32
    %c0_i32_1 = arith.constant 0 : i32
    return %c0_i32, %c0_i32_0 : i32, i32
  }
  func.func @transform_12(%arg0: i32) -> (i32, i32) {
    %c0_i32 = arith.constant 0 : i32
    %c0_i32_0 = arith.constant 0 : i32
    %c0_i32_1 = arith.constant 0 : i32
    return %c0_i32, %c0_i32_0 : i32, i32
  }
  func.func @transform_13(%arg0: i32) -> (i32, i32) {
    %c0_i32 = arith.constant 0 : i32
    %c0_i32_0 = arith.constant 0 : i32
    return %arg0, %c0_i32 : i32, i32
  }
}

</mosaic_0001>

<bundles_post_ra>
// kernel: tile.13
= control target key start
LH: loop header
LB: loop body
LE: loop exit
PB: predicated region body
PF: predicated region fallthrough
CT: control target
= control target key end

     0   :  { %s28_s0 = inlined_call_operand.vmem [shape: f32[6], index: 0, kind: input, shape index: {}]   ;;  %s29_s1 = inlined_call_operand.vmem [shape: f32[12,6], index: 1, kind: output, shape index: {}]  }
   0x1   :  { %v4_v0 = vld [vmem:[%s28_s0] ss:$0 sm:$0xff] }
   0x2   :  { %5 = vst [vmem:[%s29_s1] sm:$0xff] %v4_v0  ;;  %8 = vst [vmem:[%s29_s1 + $0x8] sm:$0xff] %v4_v0 }

// kernel: tile.14
= control target key start
LH: loop header
LB: loop body
LE: loop exit
PB: predicated region body
PF: predicated region fallthrough
CT: control target
= control target key end

     0   :  { %s99_s10 = smov 66   ;;  %s100_s11 = smov 54   ;;  %vm3_vm0 = vcmask 48128   ;;  %vm9_vm1 = vcmask 589328   ;;  %vm15_vm2 = vcmask 540128   ;;  %vm21_vm3 = vcmask 490928   ;;  %s159_s0 = inlined_call_operand.vmem [shape: f32[12,6], index: 0, kind: input, shape index: {}]   ;;  %s160_s1 = inlined_call_operand.vmem [shape: f32[1,72], index: 1, kind: output, shape index: {}]  }
   0x1   :  { %v77_v0 = vld [vmem:[%s159_s0 + $0xb] sm:$0x1]   ;;  %v79_v1 = vld [vmem:[%s159_s0 + $0x9] sm:$0x1]   ;;  %v78_v2 = vld [vmem:[%s159_s0 + $0xa] sm:$0x1]  }
   0x2   :  { %7 = vrot.lane.b32.xlu0 %v77_v0, %s99_s10  ;;  %19 = vrot.lane.b32.xlu1 %v79_v1, %s100_s11  ;;  %v80_v3 = vld [vmem:[%s159_s0 + $0x8] sm:$0x1]   ;;  %s101_s16 = smov 60   ;;  %s102_s17 = smov 48   ;;  %v81_v4 = vld [vmem:[%s159_s0 + $0x7] sm:$0x1]  }
   0x3   :  { %v2_v5 = vld [vmem:[%s159_s0] sm:$0x1]   ;;  %v82_v6 = vld [vmem:[%s159_s0 + $0x6] sm:$0x1]   ;;  %s103_s24 = smov 42   ;;  %s104_s25 = smov 36  }
   0x4   :  { %4 = vst.msk [vmem:[#allocation0] sm:$0x1] %vm3_vm0, %v2_v5   ;;  %v83_v7 = vld [vmem:[%s159_s0 + $0x5] sm:$0x1]   ;;  %v84_v8 = vld [vmem:[%s159_s0 + $0x4] sm:$0x1]  }
   0x5   :  { %s105_s30 = smov 30   ;;  %s106_s2 = smov 24   ;;  %v85_v9 = vld [vmem:[%s159_s0 + $0x3] sm:$0x1]   ;;  %v86_v10 = vld [vmem:[%s159_s0 + $0x2] sm:$0x1]  }
   0x6   :  { %13 = vrot.lane.b32.xlu0 %v78_v2, %s101_s16  ;;  %25 = vrot.lane.b32.xlu1 %v80_v3, %s102_s17  ;;  %s107_s7 = smov 18   ;;  %s108_s8 = smov 12   ;;  %v87_v11 = vld [vmem:[%s159_s0 + $0x1] sm:$0x1]   ;;  %vm27_vm4 = vcmask 441728   ;;  %vm33_vm5 = vcmask 392528  }
   0x7   :  { %s109_s0 = smov 6   ;;  %vm39_vm6 = vcmask 343328   ;;  %vm45_vm7 = vcmask 294128   ;;  %vm51_vm8 = vcmask 244928   ;;  %vm57_vm9 = vcmask 195728  }
   0x8   :  { %vm63_vm10 = vcmask 146528   ;;  %vm69_vm11 = vcmask 97328  }
   0xa   :  { %31 = vrot.lane.b32.xlu0 %v81_v4, %s103_s24  ;;  %37 = vrot.lane.b32.xlu1 %v82_v6, %s104_s25 }
   0xe   :  { %43 = vrot.lane.b32.xlu0 %v83_v7, %s105_s30  ;;  %49 = vrot.lane.b32.xlu1 %v84_v8, %s106_s2 }
  0x12   :  { %55 = vrot.lane.b32.xlu0 %v85_v9, %s107_s7  ;;  %61 = vrot.lane.b32.xlu1 %v86_v10, %s108_s8 }
  0x16   :  { %67 = vrot.lane.b32.xlu0 %v87_v11, %s109_s0 }
  0x74   :  { %v8_v12 = vpop.permute.xlu0 %7   ;;  %v20_v13 = vpop.permute.xlu1 %19  }
  0x75   :  { %10 = vst.msk [vmem:[#allocation0] sm:$0x1] %vm9_vm1, %v8_v12  }
  0x78   :  { %v14_v14 = vpop.permute.xlu0 %13   ;;  %v26_v15 = vpop.permute.xlu1 %25  }
  0x79   :  { %16 = vst.msk [vmem:[#allocation0] sm:$0x1] %vm15_vm2, %v14_v14  }
  0x7a   :  { %22 = vst.msk [vmem:[#allocation0] sm:$0x1] %vm21_vm3, %v20_v13  }
  0x7b   :  { %28 = vst.msk [vmem:[#allocation0] sm:$0x1] %vm27_vm4, %v26_v15  }
  0x7c   :  { %v32_v16 = vpop.permute.xlu0 %31   ;;  %v38_v17 = vpop.permute.xlu1 %37  }
  0x7d   :  { %34 = vst.msk [vmem:[#allocation0] sm:$0x1] %vm33_vm5, %v32_v16  }
  0x7e   :  { %40 = vst.msk [vmem:[#allocation0] sm:$0x1] %vm39_vm6, %v38_v17  }
  0x80   :  { %v44_v18 = vpop.permute.xlu0 %43   ;;  %v50_v19 = vpop.permute.xlu1 %49  }
  0x81   :  { %46 = vst.msk [vmem:[#allocation0] sm:$0x1] %vm45_vm7, %v44_v18  }
  0x82   :  { %52 = vst.msk [vmem:[#allocation0] sm:$0x1] %vm51_vm8, %v50_v19  }
  0x84   :  { %v56_v20 = vpop.permute.xlu0 %55   ;;  %v62_v21 = vpop.permute.xlu1 %61  }
  0x85   :  { %58 = vst.msk [vmem:[#allocation0] sm:$0x1] %vm57_vm9, %v56_v20  }
  0x86   :  { %64 = vst.msk [vmem:[#allocation0] sm:$0x1] %vm63_vm10, %v62_v21  }
  0x88   :  { %v68_v22 = vpop.permute.xlu0 %67  }
  0x89   :  { %70 = vst.msk [vmem:[#allocation0] sm:$0x1] %vm69_vm11, %v68_v22  }
  0x90   :  { %v74_v23 = vld [vmem:[#allocation0] sm:$0x1] }
  0x91   :  { %76 = vst [vmem:[%s160_s1] sm:$0x1] %v74_v23 }

// kernel: tile.18
= control target key start
LH: loop header
LB: loop body
LE: loop exit
PB: predicated region body
PF: predicated region fallthrough
CT: control target
= control target key end

     0   :  { %s22_s0 = inlined_call_operand.vmem [shape: f32[16], index: 0, kind: input, shape index: {}]   ;;  %s23_s1 = inlined_call_operand.vmem [shape: f32[4,16], index: 1, kind: output, shape index: {}]  }
   0x1   :  { %v4_v0 = vld [vmem:[%s22_s0] ss:$0 sm:$0xff] }
   0x2   :  { %5 = vst [vmem:[%s23_s1] sm:$0xf] %v4_v0 }

// kernel: tile.19
= control target key start
LH: loop header
LB: loop body
LE: loop exit
PB: predicated region body
PF: predicated region fallthrough
CT: control target
= control target key end

     0   :  { %vm7_vm0 = vcmask 130048   ;;  %s37_s8 = smov 16   ;;  %s38_s9 = smov 32   ;;  %vm13_vm1 = vcmask 523648   ;;  %vm19_vm2 = vcmask 392448   ;;  %vm25_vm3 = vcmask 261248   ;;  %s55_s0 = inlined_call_operand.vmem [shape: f32[4,16], index: 0, kind: input, shape index: {}]   ;;  %s56_s1 = inlined_call_operand.vmem [shape: f32[1,64], index: 1, kind: output, shape index: {}]  }
   0x1   :  { %v4_v0 = vld [vmem:[%s55_s0] sm:$0xf]  ;;  %s36_s0 = smov 48  }
   0x2   :  { %5 = vst [vmem:[#allocation1] sm:$0xf] %v4_v0 }
   0x9   :  { %v10_v1 = vld [vmem:[#allocation1 + $0x3] sm:$0x1]   ;;  %v22_v2 = vld [vmem:[#allocation1 + $0x1] sm:$0x1]   ;;  %v6_v3 = vld [vmem:[#allocation1] sm:$0x1]  }
   0xa   :  { %11 = vrot.lane.b32.xlu0 %v10_v1, %s36_s0  ;;  %23 = vrot.lane.b32.xlu1 %v22_v2, %s37_s8  ;;  %v16_v4 = vld [vmem:[#allocation1 + $0x2] sm:$0x1]   ;;  %8 = vst.msk [vmem:[#allocation0] sm:$0x1] %vm7_vm0, %v6_v3  }
   0xe   :  { %17 = vrot.lane.b32.xlu0 %v16_v4, %s38_s9 }
  0x7c   :  { %v12_v5 = vpop.permute.xlu0 %11   ;;  %v24_v6 = vpop.permute.xlu1 %23  }
  0x7d   :  { %14 = vst.msk [vmem:[#allocation0] sm:$0x1] %vm13_vm1, %v12_v5  }
  0x80   :  { %v18_v7 = vpop.permute.xlu0 %17  }
  0x81   :  { %20 = vst.msk [vmem:[#allocation0] sm:$0x1] %vm19_vm2, %v18_v7  }
  0x82   :  { %26 = vst.msk [vmem:[#allocation0] sm:$0x1] %vm25_vm3, %v24_v6  }
  0x89   :  { %v30_v8 = vld [vmem:[#allocation0] sm:$0x1] }
  0x8a   :  { %32 = vst [vmem:[%s56_s1] sm:$0x1] %v30_v8 }

// kernel: lenet_forward.1
= control target key start
LH: loop header
LB: loop body
LE: loop exit
PB: predicated region body
PF: predicated region fallthrough
CT: control target
= control target key end

     0   :  { %v3460_v1 = vmov 0.0   ;;  %vm123_vm0 = vcmask 1045504   ;;  %vm3461_vm1 = vmmov 0   ;;  %vm113_vm2 = vcmask 228352   ;;  %s4216_s0 = inlined_call_operand.vmem [shape: f32[2,28,28], index: 0, kind: input, shape index: {}]   ;;  %s4217_s1 = inlined_call_operand.vmem [shape: bf16[5,28,72], index: 1, kind: input, shape index: {}]   ;;  %s4218_s2 = inlined_call_operand.vmem [shape: bf16[5,28,72], index: 2, kind: input, shape index: {}]   ;;  %s4219_s3 = inlined_call_operand.vmem [shape: f32[1,72], index: 3, kind: input, shape index: {}]   ;;  %s4220_s4 = inlined_call_operand.vmem [shape: bf16[5,72,64], index: 4, kind: input, shape index: {}]   ;;  %s4221_s5 = inlined_call_operand.vmem [shape: bf16[5,72,64], index: 5, kind: input, shape index: {}]   ;;  %s4222_s6 = inlined_call_operand.vmem [shape: f32[1,64], index: 6, kind: input, shape index: {}]   ;;  %s4223_s7 = inlined_call_operand.vmem [shape: bf16[256,120], index: 7, kind: input, shape index: {}]   ;;  %s4224_s8 = inlined_call_operand.vmem [shape: f32[1,120], index: 8, kind: input, shape index: {}]   ;;  %s4225_s9 = inlined_call_operand.vmem [shape: bf16[120,84], index: 9, kind: input, shape index: {}]   ;;  %s4226_s10 = inlined_call_operand.vmem [shape: f32[1,84], index: 10, kind: input, shape index: {}]   ;;  %s4227_s11 = inlined_call_operand.vmem [shape: bf16[84,128], index: 11, kind: input, shape index: {}]   ;;  %s4228_s12 = inlined_call_operand.vmem [shape: f32[1,128], index: 12, kind: input, shape index: {}]   ;;  %s4229_s13 = inlined_call_operand.hbm [shape: f32[2,128], index: 13, kind: output, shape index: {}]  }
   0x1   :  { %v3336_v0 = vld [vmem:[%s4217_s1 + $0x10] sm:$0xff]   ;;  %2867 = vmatprep.subr.bf16.mxu0 %v3460_v1  ;;  %3203 = vmatprep.subr.bf16.mxu1 %v3460_v1  ;;  %v3337_v2 = vld [vmem:[%s4217_s1 + $0x18] sm:$0x3f]   ;;  %v74_v3 = vld [vmem:[%s4216_s0 + $0x1] sm:$0xff] }
   0x2   :  { %2868 = vmatpush3.bf16.msra.mxu0 %v3336_v0  ;;  %3205 = vmatpush3.bf16.msra.mxu1 %v3336_v0  ;;  %v75_v4 = vld [vmem:[%s4216_s0 + $0x9] sm:$0xff]  ;;  %v76_v5 = vld [vmem:[%s4216_s0 + $0x11] sm:$0xff]  ;;  %v125_v6 = vsel %vm123_vm0, %v3337_v2, 0  ;;  %v77_v7 = vld [vmem:[%s4216_s0 + $0x21] sm:$0xff] }
   0x3   :  { %2869 = vmatprep.subr.bf16.mxu0 %v3460_v1  ;;  %3204 = vmatprep.subr.bf16.mxu1 %v3460_v1  ;;  %v78_v8 = vld [vmem:[%s4216_s0 + $0x29] sm:$0xff]  ;;  %v80_v10 = vpack.c.bf16 %v75_v4, %v74_v3  ;;  %v3568_v12 = vpack.c.bf16 %v77_v7, %v76_v5  ;;  %v3339_v13 = vld [vmem:[%s4217_s1] sm:$0xff]   ;;  %v79_v14 = vld [vmem:[%s4216_s0 + $0x31] sm:$0xff] }
   0x4   :  { %2871 = vmatprep.mubr.msk.bf16.mxu0 %vm3461_vm1, %v3460_v1  ;;  %2875 = vmatprep.mubr.msk.bf16.mxu1 %vm3461_vm1, %v3460_v1  ;;  %v3338_v9 = vld [vmem:[%s4218_s2 + $0x10] sm:$0xff]   ;;  %v82_v11 = vpack.c.bf16 %v78_v8, %v77_v7  ;;  %v83_v15 = vpack.c.bf16 %v79_v14, %v79_v14  ;;  %v3340_v16 = vld [vmem:[%s4218_s2 + $0x18] sm:$0x3f]   ;;  %v3341_v17 = vld [vmem:[%s4217_s1 + $0x8] sm:$0x3f]  }
   0x5   :  { %v201_v20 = vsel %vm123_vm0, %v3340_v16, 0  ;;  %v284_v21 = vsel %vm123_vm0, %v3341_v17, 0  ;;  %v46_v23 = vld [vmem:[%s4216_s0] sm:$0xff]  ;;  %v47_v24 = vld [vmem:[%s4216_s0 + $0x8] sm:$0xff]  ;;  %v48_v29 = vld [vmem:[%s4216_s0 + $0x10] sm:$0xff] }
   0x6   :  { %2870 = vmatpush3.bf16.msra.mxu0 %v125_v6  ;;  %3206 = vmatpush3.bf16.msra.mxu1 %v125_v6  ;;  %v92_v18 = vunpack.c.h.b16 %v82_v11  ;;  %v93_v19 = vunpack.c.l.b16 %v83_v15  ;;  %v52_v25 = vpack.c.bf16 %v47_v24, %v46_v23  ;;  %v3344_v26 = vld [vmem:[%s4217_s1 + $0x20] sm:$0xff]   ;;  %v3345_v27 = vld [vmem:[%s4217_s1 + $0x28] sm:$0x3f]   ;;  %v51_v32 = vld [vmem:[%s4216_s0 + $0x30] sm:$0xff] }
   0x7   :  { %2883 = vmatprep.subr.bf16.mxu1 %v3460_v1  ;;  %2899 = vmatprep.subr.bf16.mxu0 %v3460_v1  ;;  %v3342_v28 = vld [vmem:[%s4218_s2] sm:$0xff]   ;;  %v50_v31 = vld [vmem:[%s4216_s0 + $0x28] sm:$0xff]  ;;  %v463_v34 = vsel %vm123_vm0, %v3345_v27, 0  ;;  %v55_v38 = vpack.c.bf16 %v51_v32, %v51_v32  ;;  %v3349_v39 = vld [vmem:[%s4217_s1 + $0x38] sm:$0x3f]  }
   0x8   :  { %v101_v22 = vpack.c.b16 %v93_v19, %v92_v18  ;;  %v49_v30 = vld [vmem:[%s4216_s0 + $0x20] sm:$0xff]  ;;  %v3343_v33 = vld [vmem:[%s4218_s2 + $0x8] sm:$0x3f]   ;;  %v3351_v41 = vld [vmem:[%s4218_s2 + $0x38] sm:$0x3f]   ;;  %v659_v46 = vsel %vm123_vm0, %v3349_v39, 0 }
   0x9   :  { %2872 = vmatmul.mubr.msk.bf16.vlgmr.msra.gmra.mrb[0].mxu0 %vm113_vm2, %v80_v10  ;;  %2876 = vmatmul.mubr.msk.bf16.vlgmr.msra.gmra.mrb[0].mxu1 %vm113_vm2, %v3568_v12  ;;  %v3347_v35 = vld [vmem:[%s4218_s2 + $0x28] sm:$0x3f]   ;;  %v54_v36 = vpack.c.bf16 %v50_v31, %v49_v30  ;;  %v2710_v37 = vpack.c.bf16 %v49_v30, %v48_v29  ;;  %v355_v40 = vsel %vm123_vm0, %v3343_v33, 0  ;;  %v65_v44 = vunpack.c.l.b16 %v55_v38  ;;  %v3348_v52 = vld [vmem:[%s4217_s1 + $0x30] sm:$0xff]   ;;  %v3346_v54 = vld [vmem:[%s4218_s2 + $0x20] sm:$0xff]  }
   0xa   :  { %2884 = vmatpush3.bf16.msra.mxu1 %v3338_v9  ;;  %2900 = vmatpush3.bf16.msra.mxu0 %v3339_v13  ;;  %v3353_v42 = vld [vmem:[%s4217_s1 + $0x48] sm:$0x3f]   ;;  %v539_v45 = vsel %vm123_vm0, %v3347_v35, 0  ;;  %v3660_v47 = vsel %vm123_vm0, %v3351_v41, 0  ;;  %v416_v55 = vld [vmem:[%s4216_s0 + $0x12] sm:$0xff]  ;;  %v3352_v4 = vld [vmem:[%s4217_s1 + $0x40] sm:$0xff]  }
   0xb   :  { %2879 = vmatprep.mubr.msk.bf16.mxu1 %vm3461_vm1, %v3460_v1  ;;  %2885 = vmatprep.subr.bf16.mxu1 %v3460_v1  ;;  %v64_v43 = vunpack.c.h.b16 %v54_v36  ;;  %v855_v48 = vsel %vm123_vm0, %v3353_v42, 0  ;;  %v414_v50 = vld [vmem:[%s4216_s0 + $0x2] sm:$0xff]  ;;  %v415_v51 = vld [vmem:[%s4216_s0 + $0xa] sm:$0xff]  ;;  %v419_v58 = vld [vmem:[%s4216_s0 + $0x32] sm:$0xff] }
   0xc   :  { %2901 = vmatprep.subr.bf16.mxu0 %v3460_v1  ;;  %2903 = vmatprep.mubr.msk.bf16.mxu0 %vm3461_vm1, %v3460_v1  ;;  %v420_v53 = vpack.c.bf16 %v415_v51, %v414_v50  ;;  %v417_v56 = vld [vmem:[%s4216_s0 + $0x22] sm:$0xff]  ;;  %v418_v57 = vld [vmem:[%s4216_s0 + $0x2a] sm:$0xff]  ;;  %v423_v61 = vpack.c.bf16 %v419_v58, %v419_v58  ;;  %v612_v7 = vld [vmem:[%s4216_s0 + $0x13] sm:$0xff] }
   0xd   :  { %v262_v49 = vpack.c.b16 %v65_v44, %v64_v43  ;;  %v422_v59 = vpack.c.bf16 %v418_v57, %v417_v56  ;;  %v2711_v60 = vpack.c.bf16 %v417_v56, %v416_v55  ;;  %v610_v2 = vld [vmem:[%s4216_s0 + $0x3] sm:$0xff]  ;;  %v611_v3 = vld [vmem:[%s4216_s0 + $0xb] sm:$0xff] }
   0xe   :  { %2886 = vmatpush3.bf16.msra.mxu1 %v201_v20  ;;  %2902 = vmatpush3.bf16.msra.mxu0 %v284_v21  ;;  %v433_v63 = vunpack.c.l.b16 %v423_v61  ;;  %v616_v5 = vpack.c.bf16 %v611_v3, %v610_v2  ;;  %v3350_v6 = vld [vmem:[%s4218_s2 + $0x30] sm:$0xff]   ;;  %v613_v8 = vld [vmem:[%s4216_s0 + $0x23] sm:$0xff] }
   0xf   :  { %2915 = vmatprep.subr.bf16.mxu1 %v3460_v1  ;;  %2931 = vmatprep.subr.bf16.mxu0 %v3460_v1  ;;  %v432_v62 = vunpack.c.h.b16 %v422_v59  ;;  %v614_v9 = vld [vmem:[%s4216_s0 + $0x2b] sm:$0xff] }
  0x10   :  { %v618_v11 = vpack.c.bf16 %v614_v9, %v613_v8 }
  0x11   :  { %2880 = vmatmul.mubr.msk.bf16.gmra.mrb[4].mxu1 %vm113_vm2, %v101_v22  ;;  %v441_v0 = vpack.c.b16 %v433_v63, %v432_v62 }
  0x12   :  { %2887 = vmatprep.mubr.msk.bf16.mxu1 %vm3461_vm1, %v3460_v1  ;;  %v628_v14 = vunpack.c.h.b16 %v618_v11 }
  0x15   :  { %2904 = vmatmul.mubr.msk.bf16.vlgmr.msra.gmra.mrb[0].mxu0 %vm113_vm2, %v52_v25 }
  0x16   :  { %2907 = vmatprep.mubr.msk.bf16.mxu0 %vm3461_vm1, %v3460_v1  ;;  %2932 = vmatpush3.bf16.msra.mxu0 %v3344_v26 }
  0x17   :  { %2933 = vmatprep.subr.bf16.mxu0 %v3460_v1 }
  0x19   :  { %2888 = vmatmul.mubr.msk.bf16.vlgmr.msra.gmra.mrb[8].mxu1 %vm113_vm2, %v80_v10  ;;  %v615_v10 = vld [vmem:[%s4216_s0 + $0x33] sm:$0xff] }
  0x1a   :  { %2916 = vmatpush3.bf16.msra.mxu1 %v3342_v28  ;;  %2891 = vmatprep.mubr.msk.bf16.mxu1 %vm3461_vm1, %v3460_v1  ;;  %v619_v13 = vpack.c.bf16 %v615_v10, %v615_v10 }
  0x1b   :  { %2917 = vmatprep.subr.bf16.mxu1 %v3460_v1  ;;  %2934 = vmatpush3.bf16.msra.mxu0 %v463_v34 }
  0x1c   :  { %2963 = vmatprep.subr.bf16.mxu0 %v3460_v1  ;;  %v629_v15 = vunpack.c.l.b16 %v619_v13 }
  0x1d   :  { %2908 = vmatmul.mubr.msk.bf16.gmra.mrb[4].mxu0 %vm113_vm2, %v2710_v37 }
  0x1e   :  { %2911 = vmatprep.mubr.msk.bf16.mxu0 %vm3461_vm1, %v3460_v1  ;;  %2918 = vmatpush3.bf16.msra.mxu1 %v355_v40 }
  0x1f   :  { %2947 = vmatprep.subr.bf16.mxu1 %v3460_v1 }
  0x21   :  { %2892 = vmatmul.mubr.msk.bf16.gmra.mrb[12].mxu1 %vm113_vm2, %v3568_v12  ;;  %v2712_v12 = vpack.c.bf16 %v613_v8, %v612_v7 }
  0x22   :  { %2895 = vmatprep.mubr.msk.bf16.mxu1 %vm3461_vm1, %v3460_v1 }
  0x25   :  { %2912 = vmatmul.mubr.msk.bf16.gmra.mrb[8].mxu0 %vm113_vm2, %v262_v49 }
  0x26   :  { %2935 = vmatprep.mubr.msk.bf16.mxu0 %vm3461_vm1, %v3460_v1 }
  0x29   :  { %2896 = vmatmul.mubr.msk.bf16.gmra.mrb[16].mxu1 %vm113_vm2, %v101_v22 }
  0x2a   :  { %2919 = vmatprep.mubr.msk.bf16.mxu1 %vm3461_vm1, %v3460_v1 }
  0x2d   :  { %2936 = vmatmul.mubr.msk.bf16.vlgmr.msra.gmra.mrb[0].mxu0 %vm113_vm2, %v420_v53 }
  0x2e   :  { %2939 = vmatprep.mubr.msk.bf16.mxu0 %vm3461_vm1, %v3460_v1  ;;  %2964 = vmatpush3.bf16.msra.mxu0 %v3348_v52 }
  0x2f   :  { %2965 = vmatprep.subr.bf16.mxu0 %v3460_v1 }
  0x31   :  { %2920 = vmatmul.mubr.msk.bf16.vlgmr.msra.gmra.mrb[8].mxu1 %vm113_vm2, %v52_v25 }
  0x32   :  { %2948 = vmatpush3.bf16.msra.mxu1 %v3346_v54  ;;  %2923 = vmatprep.mubr.msk.bf16.mxu1 %vm3461_vm1, %v3460_v1 }
  0x33   :  { %2949 = vmatprep.subr.bf16.mxu1 %v3460_v1  ;;  %2966 = vmatpush3.bf16.msra.mxu0 %v659_v46 }
  0x34   :  { %2995 = vmatprep.subr.bf16.mxu0 %v3460_v1 }
  0x35   :  { %2940 = vmatmul.mubr.msk.bf16.gmra.mrb[4].mxu0 %vm113_vm2, %v2711_v60 }
  0x36   :  { %2943 = vmatprep.mubr.msk.bf16.mxu0 %vm3461_vm1, %v3460_v1  ;;  %2950 = vmatpush3.bf16.msra.mxu1 %v539_v45 }
  0x37   :  { %2979 = vmatprep.subr.bf16.mxu1 %v3460_v1 }
  0x39   :  { %2924 = vmatmul.mubr.msk.bf16.gmra.mrb[12].mxu1 %vm113_vm2, %v2710_v37 }
  0x3a   :  { %2927 = vmatprep.mubr.msk.bf16.mxu1 %vm3461_vm1, %v3460_v1 }
  0x3d   :  { %2944 = vmatmul.mubr.msk.bf16.gmra.mrb[8].mxu0 %vm113_vm2, %v441_v0 }
  0x3e   :  { %2967 = vmatprep.mubr.msk.bf16.mxu0 %vm3461_vm1, %v3460_v1 }
  0x41   :  { %2928 = vmatmul.mubr.msk.bf16.gmra.mrb[16].mxu1 %vm113_vm2, %v262_v49 }
  0x42   :  { %2951 = vmatprep.mubr.msk.bf16.mxu1 %vm3461_vm1, %v3460_v1 }
  0x45   :  { %2968 = vmatmul.mubr.msk.bf16.vlgmr.msra.gmra.mrb[0].mxu0 %vm113_vm2, %v616_v5 }
  0x46   :  { %2971 = vmatprep.mubr.msk.bf16.mxu0 %vm3461_vm1, %v3460_v1  ;;  %2996 = vmatpush3.bf16.msra.mxu0 %v3352_v4 }
  0x47   :  { %2997 = vmatprep.subr.bf16.mxu0 %v3460_v1 }
  0x49   :  { %2952 = vmatmul.mubr.msk.bf16.vlgmr.msra.gmra.mrb[8].mxu1 %vm113_vm2, %v420_v53 }
  0x4a   :  { %2980 = vmatpush3.bf16.msra.mxu1 %v3350_v6  ;;  %2955 = vmatprep.mubr.msk.bf16.mxu1 %vm3461_vm1, %v3460_v1 }
  0x4b   :  { %2981 = vmatprep.subr.bf16.mxu1 %v3460_v1  ;;  %2998 = vmatpush3.bf16.msra.mxu0 %v855_v48 }
  0x4c   :  { %3027 = vmatprep.subr.bf16.mxu0 %v3460_v1 }
  0x4d   :  { %2972 = vmatmul.mubr.msk.bf16.gmra.mrb[4].mxu0 %vm113_vm2, %v2712_v12 }
  0x4e   :  { %2975 = vmatprep.mubr.msk.bf16.mxu0 %vm3461_vm1, %v3460_v1  ;;  %2982 = vmatpush3.bf16.msra.mxu1 %v3660_v47 }
  0x4f   :  { %3011 = vmatprep.subr.bf16.mxu1 %v3460_v1 }
  0x50   :  { %18 = vsyncpa [#allocation7], 0  ;;  %v637_v16 = vpack.c.b16 %v629_v15, %v628_v14  ;;  %v806_v17 = vld [vmem:[%s4216_s0 + $0x4] sm:$0xff]  ;;  %v807_v18 = vld [vmem:[%s4216_s0 + $0xc] sm:$0xff]  ;;  %vm1125_vm3 = vcmask 1043456   ;;  %vm1008_vm4 = vcmask 588800  }
  0x51   :  { %2956 = vmatmul.mubr.msk.bf16.gmra.mrb[12].mxu1 %vm113_vm2, %v2711_v60  ;;  %v812_v19 = vpack.c.bf16 %v807_v18, %v806_v17  ;;  %v3354_v20 = vld [vmem:[%s4218_s2 + $0x40] sm:$0xff]   ;;  %v808_v21 = vld [vmem:[%s4216_s0 + $0x14] sm:$0xff]  ;;  %v810_v23 = vld [vmem:[%s4216_s0 + $0x2c] sm:$0xff]  ;;  %vm1050_vm5 = vcmask 584704   ;;  %vm1937_vm6 = vcmask 523264   ;;  %vm1981_vm7 = vcmask 1041409  }
  0x52   :  { %2959 = vmatprep.mubr.msk.bf16.mxu1 %vm3461_vm1, %v3460_v1  ;;  %v809_v22 = vld [vmem:[%s4216_s0 + $0x24] sm:$0xff]  ;;  %v811_v24 = vld [vmem:[%s4216_s0 + $0x34] sm:$0xff]  ;;  %v3358_v43 = vld [vmem:[%s4220_s4 + $0x2c] sm:$0xff]   ;;  %vm1983_vm8 = vcmask 1043459   ;;  %vm1985_vm9 = vcmask 1045509   ;;  %vm1987_vm10 = vcmask 1047559  }
  0x53   :  { %v3355_v25 = vld [vmem:[%s4218_s2 + $0x48] sm:$0x3f]   ;;  %v814_v26 = vpack.c.bf16 %v810_v23, %v809_v22  ;;  %v2713_v27 = vpack.c.bf16 %v809_v22, %v808_v21  ;;  %v815_v28 = vpack.c.bf16 %v811_v24, %v811_v24  ;;  %v3360_v45 = vld [vmem:[%s4220_s4 + $0x34] sm:$0xff]   ;;  %v3362_v47 = vld [vmem:[%s4220_s4 + $0x3c] sm:$0xff]   ;;  %vm1990_vm11 = vcmask 517120   ;;  %s3463_s24 = smov 64  }
  0x54   :  { %v931_v29 = vsel %vm123_vm0, %v3355_v25, 0  ;;  %v3356_v38 = vld [vmem:[%s4220_s4 + $0x24] sm:$0xff]   ;;  %v3359_v44 = vld [vmem:[%s4221_s5 + $0x2c] sm:$0xff]   ;;  %v3361_v46 = vld [vmem:[%s4221_s5 + $0x34] sm:$0xff]   ;;  %vm2002_vm12 = vcmask 1041920   ;;  %vm2284_vm13 = vcmask 982016  }
  0x55   :  { %2976 = vmatmul.mubr.msk.bf16.gmra.mrb[8].mxu0 %vm113_vm2, %v637_v16  ;;  %v824_v30 = vunpack.c.h.b16 %v814_v26  ;;  %v825_v31 = vunpack.c.l.b16 %v815_v28  ;;  %v3357_v39 = vld [vmem:[%s4221_s5 + $0x24] sm:$0xff]   ;;  %v3363_v48 = vld [vmem:[%s4221_s5 + $0x3c] sm:$0xff]   ;;  %vm2388_vm14 = vcmask 1041408   ;;  %vm2384_vm15 = vcmask 687104  }
  0x56   :  { %2999 = vmatprep.mubr.msk.bf16.mxu0 %vm3461_vm1, %v3460_v1  ;;  %v3364_v49 = vld [vmem:[%s4220_s4 + $0x44] ss:$0 sps:$4 sm:$0xff]  }
  0x57   :  { %v833_v32 = vpack.c.b16 %v825_v31, %v824_v30  ;;  %v3365_v50 = vld [vmem:[%s4221_s5 + $0x44] ss:$0 sps:$4 sm:$0xff]   ;;  %v1127_v51 = vsel %vm1125_vm3, %v3364_v49, 0 }
  0x58   :  { %v1208_v52 = vsel %vm1125_vm3, %v3365_v50, 0  ;;  %v3368_v50 = vld [vmem:[%s4220_s4 + $0x8] sm:$0xff]  }
  0x59   :  { %2960 = vmatmul.mubr.msk.bf16.gmra.mrb[16].mxu1 %vm113_vm2, %v441_v0 }
  0x5a   :  { %2983 = vmatprep.mubr.msk.bf16.mxu1 %vm3461_vm1, %v3460_v1 }
  0x5d   :  { %3000 = vmatmul.mubr.msk.bf16.vlgmr.msra.gmra.mrb[0].mxu0 %vm113_vm2, %v812_v19 }
  0x5e   :  { %3003 = vmatprep.mubr.msk.bf16.mxu0 %vm3461_vm1, %v3460_v1  ;;  %3028 = vmatpush3.bf16.msra.mxu0 %v3356_v38 }
  0x5f   :  { %3029 = vmatprep.subr.bf16.mxu0 %v3460_v1 }
  0x61   :  { %2984 = vmatmul.mubr.msk.bf16.vlgmr.msra.gmra.mrb[8].mxu1 %vm113_vm2, %v616_v5 }
  0x62   :  { %3012 = vmatpush3.bf16.msra.mxu1 %v3354_v20  ;;  %2987 = vmatprep.mubr.msk.bf16.mxu1 %vm3461_vm1, %v3460_v1  ;;  %v2534_v20 = vld [vmem:[%s4219_s3] ss:$0 sm:$0xff] }
  0x63   :  { %3013 = vmatprep.subr.bf16.mxu1 %v3460_v1  ;;  %3030 = vmatpush3.bf16.msra.mxu0 %v3358_v43 }
  0x64   :  { %3031 = vmatprep.subr.bf16.mxu0 %v3460_v1 }
  0x65   :  { %3004 = vmatmul.mubr.msk.bf16.gmra.mrb[4].mxu0 %vm113_vm2, %v2713_v27 }
  0x66   :  { %3007 = vmatprep.mubr.msk.bf16.mxu0 %vm3461_vm1, %v3460_v1  ;;  %3014 = vmatpush3.bf16.msra.mxu1 %v931_v29 }
  0x67   :  { %3041 = vmatprep.subr.bf16.mxu1 %v3460_v1  ;;  %3032 = vmatpush3.bf16.msra.mxu0 %v3360_v45  ;;  %v3366_v45 = vld [vmem:[%s4220_s4] sm:$0xff]  }
  0x68   :  { %3033 = vmatprep.subr.bf16.mxu0 %v3460_v1 }
  0x69   :  { %2988 = vmatmul.mubr.msk.bf16.gmra.mrb[12].mxu1 %vm113_vm2, %v2712_v12 }
  0x6a   :  { %2991 = vmatprep.mubr.msk.bf16.mxu1 %vm3461_vm1, %v3460_v1 }
  0x6b   :  { %3034 = vmatpush3.bf16.msra.mxu0 %v3362_v47 }
  0x6c   :  { %3035 = vmatprep.subr.bf16.mxu0 %v3460_v1 }
  0x6d   :  { %3008 = vmatmul.mubr.msk.bf16.gmra.mrb[8].mxu0 %vm113_vm2, %v833_v32 }
  0x6e   :  { %3037 = vmatprep.mubr.msk.bf16.mxu0 %vm3461_vm1, %v3460_v1 }
  0x6f   :  { %3036 = vmatpush3.bf16.msra.mxu0 %v1127_v51  ;;  %v3369_v51 = vld [vmem:[%s4221_s5 + $0x8] sm:$0xff]  }
  0x70   :  { %3055 = vmatprep.subr.bf16.mxu0 %v3460_v1 }
  0x71   :  { %2992 = vmatmul.mubr.msk.bf16.gmra.mrb[16].mxu1 %vm113_vm2, %v637_v16 }
  0x72   :  { %3015 = vmatprep.mubr.msk.bf16.mxu1 %vm3461_vm1, %v3460_v1 }
  0x79   :  { %3016 = vmatmul.mubr.msk.bf16.vlgmr.msra.gmra.mrb[8].mxu1 %vm113_vm2, %v812_v19 }
  0x7a   :  { %3019 = vmatprep.mubr.msk.bf16.mxu1 %vm3461_vm1, %v3460_v1  ;;  %3042 = vmatpush3.bf16.msra.mxu1 %v3357_v39 }
  0x7b   :  { %3043 = vmatprep.subr.bf16.mxu1 %v3460_v1 }
  0x7e   :  { %3044 = vmatpush3.bf16.msra.mxu1 %v3359_v44 }
  0x7f   :  { %3045 = vmatprep.subr.bf16.mxu1 %v3460_v1 }
  0x81   :  { %3020 = vmatmul.mubr.msk.bf16.gmra.mrb[12].mxu1 %vm113_vm2, %v2713_v27 }
  0x82   :  { %3023 = vmatprep.mubr.msk.bf16.mxu1 %vm3461_vm1, %v3460_v1  ;;  %3046 = vmatpush3.bf16.msra.mxu1 %v3361_v46 }
  0x83   :  { %3047 = vmatprep.subr.bf16.mxu1 %v3460_v1 }
  0x86   :  { %3048 = vmatpush3.bf16.msra.mxu1 %v3363_v48  ;;  %v3367_v48 = vld [vmem:[%s4221_s5] sm:$0xff]  }
  0x87   :  { %3049 = vmatprep.subr.bf16.mxu1 %v3460_v1 }
  0x89   :  { %3024 = vmatmul.mubr.msk.bf16.gmra.mrb[16].mxu1 %vm113_vm2, %v833_v32 }
  0x8a   :  { %3051 = vmatprep.mubr.msk.bf16.mxu1 %vm3461_vm1, %v3460_v1  ;;  %3050 = vmatpush3.bf16.msra.mxu1 %v1208_v52  ;;  %v3370_v52 = vld [vmem:[%s4220_s4 + $0x10] sm:$0xff]  }
  0x8b   :  { %3069 = vmatprep.subr.bf16.mxu1 %v3460_v1 }
  0xdc   :  { %v169_v33 = vpop.f32.mrb[0].mxu1 }
  0xdd   :  { %v2877_v34 = vpop.f32.mrb[1].mxu1 }
  0xde   :  { %v172_v35 = vpop.f32.mrb[2].mxu1 }
  0xdf   :  { %v2878_v36 = vpop.f32.mrb[3].mxu1 }
  0xe4   :  { %v177_v37 = vpop.f32.mrb[4].mxu1 }
  0xe5   :  { %v2881_v40 = vpop.f32.mrb[5].mxu1 }
  0xe6   :  { %v180_v41 = vpop.f32.mrb[6].mxu1 }
  0xe7   :  { %v2882_v42 = vpop.f32.mrb[7].mxu1 }
 0x130   :  { %v891_v53 = vpop.f32.mrb[0].mxu0 }
 0x131   :  { %v3001_v54 = vpop.f32.mrb[1].mxu0 }
 0x132   :  { %v894_v55 = vpop.f32.mrb[2].mxu0  ;;  %v3372_v54 = vld [vmem:[%s4220_s4 + $0x18] sm:$0xff]  }
 0x133   :  { %v3002_v56 = vpop.f32.mrb[3].mxu0 }
 0x134   :  { %v3374_v56 = vld [vmem:[%s4220_s4 + $0x20] ss:$0 sps:$4 sm:$0xff]  }
 0x138   :  { %v899_v57 = vpop.f32.mrb[4].mxu0 }
 0x139   :  { %v3207_v58 = vadd.f32 %v899_v57, %v169_v33  ;;  %v3005_v59 = vpop.f32.mrb[5].mxu0  ;;  %v3375_v57 = vld [vmem:[%s4221_s5 + $0x20] ss:$0 sps:$4 sm:$0xff]  }
 0x13a   :  { %v902_v60 = vpop.f32.mrb[6].mxu0  ;;  %v1358_v59 = vsel %vm1125_vm3, %v3375_v57, 0 }
 0x13b   :  { %v3208_v61 = vadd.f32 %v902_v60, %v172_v35  ;;  %v3006_v62 = vpop.f32.mrb[7].mxu0 }
 0x13c   :  { %v3376_v62 = vld [vmem:[%s4220_s4 + $0x48] sm:$0xff]  }
 0x140   :  { %v907_v63 = vpop.f32.mrb[8].mxu0 }
 0x141   :  { %v3209_v0 = vadd.f32 %v907_v63, %v177_v37  ;;  %v3009_v2 = vpop.f32.mrb[9].mxu0  ;;  %v3377_v63 = vld [vmem:[%s4221_s5 + $0x48] sm:$0xff]  }
 0x142   :  { %v910_v3 = vpop.f32.mrb[10].mxu0  ;;  %v3378_v2 = vld [vmem:[%s4220_s4 + $0x50] sm:$0xff]  }
 0x143   :  { %v3210_v4 = vadd.f32 %v910_v3, %v180_v41  ;;  %v3010_v5 = vpop.f32.mrb[11].mxu0  ;;  %v3379_v3 = vld [vmem:[%s4221_s5 + $0x50] sm:$0xff]  }
 0x144   :  { %v3381_v5 = vld [vmem:[%s4221_s5 + $0x58] sm:$0xff]  }
 0x14c   :  { %v967_v6 = vpop.f32.mrb[8].mxu1 }
 0x14d   :  { %v1002_v7 = vmax.f32 %v891_v53, %v967_v6  ;;  %v3017_v8 = vpop.f32.mrb[9].mxu1  ;;  %v3371_v53 = vld [vmem:[%s4221_s5 + $0x10] sm:$0xff]   ;;  %v3382_v6 = vld [vmem:[%s4220_s4 + $0x60] sm:$0xff]  }
 0x14e   :  { %v970_v9 = vpop.f32.mrb[10].mxu1  ;;  %v3384_v8 = vld [vmem:[%s4220_s4 + $0x68] ss:$0 sps:$4 sm:$0xff]  }
 0x14f   :  { %1009 = vst.msk [vmem:[#allocation2] sm:$0xff] %vm1008_vm4, %v1002_v7  ;;  %v1003_v10 = vmax.f32 %v894_v55, %v970_v9  ;;  %v3018_v11 = vpop.f32.mrb[11].mxu1  ;;  %v3373_v55 = vld [vmem:[%s4221_s5 + $0x18] sm:$0xff]   ;;  %v3383_v7 = vld [vmem:[%s4221_s5 + $0x60] sm:$0xff]   ;;  %v3385_v9 = vld [vmem:[%s4221_s5 + $0x68] ss:$0 sps:$4 sm:$0xff]  }
 0x150   :  { %v1532_v11 = vsel %vm1125_vm3, %v3385_v9, 0  ;;  %v3414_v9 = vld [vmem:[%s4223_s7 + $0x60] sm:$0xff]  }
 0x151   :  { %1010 = vst.msk [vmem:[#allocation2 + $0x8] sm:$0xff] %vm1008_vm4, %v1003_v10  ;;  %v1451_v10 = vsel %vm1125_vm3, %v3384_v8, 0 }
 0x154   :  { %v975_v12 = vpop.f32.mrb[12].mxu1 }
 0x155   :  { %v1004_v13 = vmax.f32 %v3207_v58, %v975_v12  ;;  %v3021_v14 = vpop.f32.mrb[13].mxu1  ;;  %v1287_v58 = vsel %vm1125_vm3, %v3374_v56, 0 }
 0x156   :  { %v978_v15 = vpop.f32.mrb[14].mxu1  ;;  %v3386_v14 = vld [vmem:[%s4220_s4 + $0x6c] sm:$0xff]  }
 0x157   :  { %1011 = vst.msk [vmem:[#allocation2 + $0x10] sm:$0xff] %vm1008_vm4, %v1004_v13  ;;  %v1005_v16 = vmax.f32 %v3208_v61, %v978_v15  ;;  %v3022_v17 = vpop.f32.mrb[15].mxu1  ;;  %v3387_v15 = vld [vmem:[%s4221_s5 + $0x6c] sm:$0xff]  }
 0x158   :  { %v1015_v18 = vld [vmem:[#allocation2] ss:$2 sm:$0xff]  ;;  %v1023_v19 = vld [vmem:[#allocation2 + $0x1] ss:$2 sm:$0xff]  ;;  %v3388_v17 = vld [vmem:[%s4220_s4 + $0x74] sm:$0xff]  }
 0x159   :  { %v1030_v21 = vmax.f32 %v1015_v18, %v1023_v19  ;;  %1012 = vst.msk [vmem:[#allocation2 + $0x18] sm:$0xff] %vm1008_vm4, %v1005_v16  ;;  %v3389_v18 = vld [vmem:[%s4221_s5 + $0x74] sm:$0xff]   ;;  %v3390_v19 = vld [vmem:[%s4220_s4 + $0x7c] sm:$0xff]  }
 0x15b   :  { %v1041_v22 = vadd.f32 %v2534_v20, %v1030_v21  ;;  %v3392_v21 = vld [vmem:[%s4220_s4 + $0x84] sm:$0xff]  }
 0x15c   :  { %v983_v23 = vpop.f32.mrb[16].mxu1 }
 0x15d   :  { %v1045_v24 = vmax.f32 %v1041_v22, 0.0  ;;  %v1006_v25 = vmax.f32 %v3209_v0, %v983_v23  ;;  %v3025_v26 = vpop.f32.mrb[17].mxu1  ;;  %v3393_v22 = vld [vmem:[%s4221_s5 + $0x84] sm:$0xff]   ;;  %v3394_v23 = vld [vmem:[%s4220_s4 + $0x8c] ss:$0 sps:$4 sm:$0xff]  }
 0x15e   :  { %v1017_v27 = vld [vmem:[#allocation2 + $0x10] ss:$2 sm:$0xf]  ;;  %v1025_v28 = vld [vmem:[#allocation2 + $0x11] ss:$2 sm:$0xf] }
 0x15f   :  { %1049 = vst.msk [vmem:[#allocation3] sm:$0xff] %vm1008_vm4, %v1045_v24  ;;  %v1031_v29 = vmax.f32 %v1017_v27, %v1025_v28  ;;  %1013 = vst.msk [vmem:[#allocation2 + $0x20] sm:$0xff] %vm1008_vm4, %v1006_v25  ;;  %v986_v30 = vpop.f32.mrb[18].mxu1  ;;  %v3395_v24 = vld [vmem:[%s4221_s5 + $0x8c] ss:$0 sps:$4 sm:$0xff]   ;;  %v1629_v25 = vsel %vm1125_vm3, %v3394_v23, 0 }
 0x160   :  { %v1007_v31 = vmax.f32 %v3210_v4, %v986_v30  ;;  %v3026_v32 = vpop.f32.mrb[19].mxu1  ;;  %v3380_v4 = vld [vmem:[%s4220_s4 + $0x58] sm:$0xff]   ;;  %v1710_v26 = vsel %vm1125_vm3, %v3395_v24, 0  ;;  %v3397_v30 = vld [vmem:[%s4221_s5 + $0x90] sm:$0xff]  }
 0x161   :  { %v1042_v33 = vadd.f32 %v2534_v20, %v1031_v29  ;;  %v3396_v29 = vld [vmem:[%s4220_s4 + $0x90] sm:$0xff]   ;;  %v3398_v32 = vld [vmem:[%s4220_s4 + $0x98] sm:$0xff]  }
 0x162   :  { %1014 = vst.msk [vmem:[#allocation2 + $0x28] sm:$0xff] %vm1008_vm4, %v1007_v31 }
 0x163   :  { %v1046_v34 = vmax.f32 %v1042_v33, 0.0  ;;  %v3399_v33 = vld [vmem:[%s4221_s5 + $0x98] sm:$0xff]  }
 0x165   :  { %1051 = vst.msk [vmem:[#allocation3 + $0x8] sm:$0xf] %vm1050_vm5, %v1046_v34  ;;  %v3400_v34 = vld [vmem:[%s4220_s4 + $0xa0] sm:$0xff]  }
 0x166   :  { %v1019_v35 = vld [vmem:[#allocation2 + $0x18] ss:$2 sm:$0xff]  ;;  %v1027_v36 = vld [vmem:[#allocation2 + $0x19] ss:$2 sm:$0xff]  ;;  %v1054_v61 = vld [vmem:[#allocation3] sm:$0xff] }
 0x167   :  { %v1032_v37 = vmax.f32 %v1019_v35, %v1027_v36  ;;  %v3401_v35 = vld [vmem:[%s4221_s5 + $0xa0] sm:$0xff]   ;;  %v3402_v36 = vld [vmem:[%s4220_s4 + $0xa8] sm:$0xff]  }
 0x169   :  { %v1043_v38 = vadd.f32 %v2534_v20, %v1032_v37  ;;  %v1021_v39 = vld [vmem:[#allocation2 + $0x28] ss:$2 sm:$0xf]  ;;  %v1029_v40 = vld [vmem:[#allocation2 + $0x29] ss:$2 sm:$0xf] }
 0x16a   :  { %v1033_v41 = vmax.f32 %v1021_v39, %v1029_v40  ;;  %v3403_v37 = vld [vmem:[%s4221_s5 + $0xa8] sm:$0xff]   ;;  %v3405_v39 = vld [vmem:[%s4221_s5 + $0xb0] ss:$0 sps:$4 sm:$0xff]  }
 0x16b   :  { %v1047_v42 = vmax.f32 %v1043_v38, 0.0  ;;  %v3404_v38 = vld [vmem:[%s4220_s4 + $0xb0] ss:$0 sps:$4 sm:$0xff]  }
 0x16c   :  { %v1044_v43 = vadd.f32 %v2534_v20, %v1033_v41  ;;  %v1076_v46 = vld [vmem:[#allocation3 + $0x1] sm:$0xff]  ;;  %v3391_v20 = vld [vmem:[%s4221_s5 + $0x7c] sm:$0xff]   ;;  %v1807_v40 = vsel %vm1125_vm3, %v3404_v38, 0  ;;  %v1888_v41 = vsel %vm1125_vm3, %v3405_v39, 0 }
 0x16d   :  { %1052 = vst.msk [vmem:[#allocation3 + $0x10] sm:$0xff] %vm1008_vm4, %v1047_v42  ;;  %v1401_v13 = vld [vmem:[#allocation3 + $0x2] sm:$0xff] }
 0x16e   :  { %v1048_v44 = vmax.f32 %v1044_v43, 0.0  ;;  %v1579_v28 = vld [vmem:[#allocation3 + $0x3] sm:$0xff] }
 0x16f   :  { %v1757_v43 = vld [vmem:[#allocation3 + $0x4] sm:$0xff] }
 0x170   :  { %1053 = vst.msk [vmem:[#allocation3 + $0x18] sm:$0xf] %vm1050_vm5, %v1048_v44 }
 0x174   :  { %v1055_v60 = vld [vmem:[#allocation3 + $0x10] sm:$0xff] }
 0x175   :  { %v2715_v0 = vpack.c.bf16 %v1055_v60, %v1054_v61 }
 0x177   :  { %v1077_v47 = vld [vmem:[#allocation3 + $0x11] sm:$0xff] }
 0x178   :  { %v2714_v49 = vpack.c.bf16 %v1077_v47, %v1076_v46  ;;  %v1402_v12 = vld [vmem:[#allocation3 + $0x12] sm:$0xff] }
 0x179   :  { %v2716_v16 = vpack.c.bf16 %v1402_v12, %v1401_v13  ;;  %v1580_v27 = vld [vmem:[#allocation3 + $0x13] sm:$0xff] }
 0x17a   :  { %3038 = vmatmul.mubr.msk.bf16.vlgmr.msra.gmra.mrb[12].mxu0 %vm1008_vm4, %v2714_v49  ;;  %3052 = vmatmul.mubr.msk.bf16.vlgmr.msra.gmra.mrb[20].mxu1 %vm1008_vm4, %v2714_v49  ;;  %v2717_v31 = vpack.c.bf16 %v1580_v27, %v1579_v28  ;;  %v1758_v42 = vld [vmem:[#allocation3 + $0x14] sm:$0xff]  ;;  %v3410_v49 = vld [vmem:[%s4223_s7 + $0x50] sm:$0xff]   ;;  %v3420_v27 = vld [vmem:[%s4223_s7 + $0x78] sm:$0xff]  }
 0x17b   :  { %3056 = vmatpush3.bf16.msra.mxu0 %v3366_v45  ;;  %3070 = vmatpush3.bf16.msra.mxu1 %v3367_v48  ;;  %v2718_v44 = vpack.c.bf16 %v1758_v42, %v1757_v43  ;;  %v3406_v45 = vld [vmem:[%s4223_s7 + $0x40] sm:$0xff]   ;;  %v3408_v47 = vld [vmem:[%s4223_s7 + $0x48] sm:$0xff]  }
 0x17c   :  { %3057 = vmatprep.subr.bf16.mxu0 %v3460_v1  ;;  %3071 = vmatprep.subr.bf16.mxu1 %v3460_v1  ;;  %v3407_v46 = vld [vmem:[%s4223_s7] sm:$0xff]   ;;  %v3409_v48 = vld [vmem:[%s4223_s7 + $0x8] sm:$0xff]  }
 0x17d   :  { %3065 = vmatprep.mubr.msk.bf16.mxu0 %vm3461_vm1, %v3460_v1  ;;  %3079 = vmatprep.mubr.msk.bf16.mxu1 %vm3461_vm1, %v3460_v1 }
 0x17f   :  { %3058 = vmatpush3.bf16.msra.mxu0 %v3368_v50  ;;  %3072 = vmatpush3.bf16.msra.mxu1 %v3369_v51  ;;  %v3411_v50 = vld [vmem:[%s4223_s7 + $0x10] sm:$0xff]   ;;  %v3412_v51 = vld [vmem:[%s4223_s7 + $0x58] sm:$0xff]  }
 0x180   :  { %3059 = vmatprep.subr.bf16.mxu0 %v3460_v1  ;;  %3073 = vmatprep.subr.bf16.mxu1 %v3460_v1 }
 0x183   :  { %3060 = vmatpush3.bf16.msra.mxu0 %v3370_v52  ;;  %3074 = vmatpush3.bf16.msra.mxu1 %v3371_v53  ;;  %v3413_v52 = vld [vmem:[%s4223_s7 + $0x18] sm:$0xff]  }
 0x184   :  { %3061 = vmatprep.subr.bf16.mxu0 %v3460_v1  ;;  %3075 = vmatprep.subr.bf16.mxu1 %v3460_v1 }
 0x187   :  { %3062 = vmatpush3.bf16.msra.mxu0 %v3372_v54  ;;  %3076 = vmatpush3.bf16.msra.mxu1 %v3373_v55 }
 0x188   :  { %3063 = vmatprep.subr.bf16.mxu0 %v3460_v1  ;;  %3077 = vmatprep.subr.bf16.mxu1 %v3460_v1 }
 0x18b   :  { %3064 = vmatpush3.bf16.msra.mxu0 %v1287_v58  ;;  %3078 = vmatpush3.bf16.msra.mxu1 %v1358_v59 }
 0x18c   :  { %3083 = vmatprep.subr.bf16.mxu0 %v3460_v1  ;;  %3097 = vmatprep.subr.bf16.mxu1 %v3460_v1 }
 0x18e   :  { %3066 = vmatmul.mubr.msk.bf16.vlgmr.msra.gmra.mrb[12].mxu0 %vm1008_vm4, %v2715_v0  ;;  %3080 = vmatmul.mubr.msk.bf16.vlgmr.msra.gmra.mrb[20].mxu1 %vm1008_vm4, %v2715_v0 }
 0x18f   :  { %3084 = vmatpush3.bf16.msra.mxu0 %v3376_v62  ;;  %3098 = vmatpush3.bf16.msra.mxu1 %v3377_v63  ;;  %v3462_v63 = vmov 1983009808  }
 0x190   :  { %3085 = vmatprep.subr.bf16.mxu0 %v3460_v1  ;;  %3099 = vmatprep.subr.bf16.mxu1 %v3460_v1  ;;  %v1963_v0 = vunpack.c.l.s4 %v3462_v63 }
 0x191   :  { %3093 = vmatprep.mubr.msk.bf16.mxu0 %vm3461_vm1, %v3460_v1  ;;  %3107 = vmatprep.mubr.msk.bf16.mxu1 %vm3461_vm1, %v3460_v1 }
 0x193   :  { %3086 = vmatpush3.bf16.msra.mxu0 %v3378_v2  ;;  %3100 = vmatpush3.bf16.msra.mxu1 %v3379_v3  ;;  %v1965_v2 = vlaneseq  ;;  %v2672_v3 = vld [vmem:[%s4222_s6] ss:$0 sm:$0xff] }
 0x194   :  { %3087 = vmatprep.subr.bf16.mxu0 %v3460_v1  ;;  %3101 = vmatprep.subr.bf16.mxu1 %v3460_v1 }
 0x197   :  { %3088 = vmatpush3.bf16.msra.mxu0 %v3380_v4  ;;  %3102 = vmatpush3.bf16.msra.mxu1 %v3381_v5  ;;  %v1964_v4 = vunpack.c.0.s8 %v1963_v0  ;;  %v1966_v5 = vshrl.u32 %v1965_v2, 7  ;;  %v3430_v0 = vld [vmem:[%s4227_s11] sm:$0xff]   ;;  %v3431_v2 = vld [vmem:[%s4227_s11 + $0x8] sm:$0xff]  }
 0x198   :  { %3089 = vmatprep.subr.bf16.mxu0 %v3460_v1  ;;  %3103 = vmatprep.subr.bf16.mxu1 %v3460_v1 }
 0x19b   :  { %3090 = vmatpush3.bf16.msra.mxu0 %v3382_v6  ;;  %3104 = vmatpush3.bf16.msra.mxu1 %v3383_v7 }
 0x19c   :  { %3091 = vmatprep.subr.bf16.mxu0 %v3460_v1  ;;  %3105 = vmatprep.subr.bf16.mxu1 %v3460_v1 }
 0x19f   :  { %3092 = vmatpush3.bf16.msra.mxu0 %v1451_v10  ;;  %3106 = vmatpush3.bf16.msra.mxu1 %v1532_v11 }
 0x1a0   :  { %3111 = vmatprep.subr.bf16.mxu0 %v3460_v1  ;;  %3125 = vmatprep.subr.bf16.mxu1 %v3460_v1 }
 0x1a2   :  { %3094 = vmatmul.mubr.msk.bf16.vlgmr.msra.gmra.mrb[12].mxu0 %vm1008_vm4, %v2716_v16  ;;  %3108 = vmatmul.mubr.msk.bf16.vlgmr.msra.gmra.mrb[20].mxu1 %vm1008_vm4, %v2716_v16 }
 0x1a3   :  { %3112 = vmatpush3.bf16.msra.mxu0 %v3386_v14  ;;  %3126 = vmatpush3.bf16.msra.mxu1 %v3387_v15  ;;  %v1967_v14 = vsub.s32 %v1964_v4, %v1966_v5  ;;  %v3415_v15 = vld [vmem:[%s4223_s7 + $0x20] sm:$0xff]   ;;  %v3433_v4 = vld [vmem:[%s4227_s11 + $0x18] sm:$0xff]  }
 0x1a4   :  { %3113 = vmatprep.subr.bf16.mxu0 %v3460_v1  ;;  %3127 = vmatprep.subr.bf16.mxu1 %v3460_v1 }
 0x1a5   :  { %3121 = vmatprep.mubr.msk.bf16.mxu0 %vm3461_vm1, %v3460_v1  ;;  %3135 = vmatprep.mubr.msk.bf16.mxu1 %vm3461_vm1, %v3460_v1 }
 0x1a7   :  { %3114 = vmatpush3.bf16.msra.mxu0 %v3388_v17  ;;  %3128 = vmatpush3.bf16.msra.mxu1 %v3389_v18  ;;  %v3416_v18 = vld [vmem:[%s4223_s7 + $0x68] sm:$0xff]  }
 0x1a8   :  { %3115 = vmatprep.subr.bf16.mxu0 %v3460_v1  ;;  %3129 = vmatprep.subr.bf16.mxu1 %v3460_v1 }
 0x1ab   :  { %3116 = vmatpush3.bf16.msra.mxu0 %v3390_v19  ;;  %3130 = vmatpush3.bf16.msra.mxu1 %v3391_v20  ;;  %v3417_v19 = vld [vmem:[%s4223_s7 + $0x28] sm:$0xff]   ;;  %v3418_v20 = vld [vmem:[%s4223_s7 + $0x70] sm:$0xff]  }
 0x1ac   :  { %3117 = vmatprep.subr.bf16.mxu0 %v3460_v1  ;;  %3131 = vmatprep.subr.bf16.mxu1 %v3460_v1 }
 0x1af   :  { %3118 = vmatpush3.bf16.msra.mxu0 %v3392_v21  ;;  %3132 = vmatpush3.bf16.msra.mxu1 %v3393_v22 }
 0x1b0   :  { %3119 = vmatprep.subr.bf16.mxu0 %v3460_v1  ;;  %3133 = vmatprep.subr.bf16.mxu1 %v3460_v1 }
 0x1b3   :  { %3120 = vmatpush3.bf16.msra.mxu0 %v1629_v25  ;;  %3134 = vmatpush3.bf16.msra.mxu1 %v1710_v26  ;;  %v3419_v26 = vld [vmem:[%s4223_s7 + $0x30] sm:$0xff]  }
 0x1b4   :  { %3139 = vmatprep.subr.bf16.mxu0 %v3460_v1  ;;  %3153 = vmatprep.subr.bf16.mxu1 %v3460_v1 }
 0x1b6   :  { %3122 = vmatmul.mubr.msk.bf16.vlgmr.msra.gmra.mrb[12].mxu0 %vm1008_vm4, %v2717_v31  ;;  %3136 = vmatmul.mubr.msk.bf16.vlgmr.msra.gmra.mrb[20].mxu1 %vm1008_vm4, %v2717_v31 }
 0x1b7   :  { %3140 = vmatpush3.bf16.msra.mxu0 %v3396_v29  ;;  %3154 = vmatpush3.bf16.msra.mxu1 %v3397_v30 }
 0x1b8   :  { %3141 = vmatprep.subr.bf16.mxu0 %v3460_v1  ;;  %3155 = vmatprep.subr.bf16.mxu1 %v3460_v1 }
 0x1b9   :  { %3149 = vmatprep.mubr.msk.bf16.mxu0 %vm3461_vm1, %v3460_v1  ;;  %3163 = vmatprep.mubr.msk.bf16.mxu1 %vm3461_vm1, %v3460_v1 }
 0x1bb   :  { %3142 = vmatpush3.bf16.msra.mxu0 %v3398_v32  ;;  %3156 = vmatpush3.bf16.msra.mxu1 %v3399_v33 }
 0x1bc   :  { %3143 = vmatprep.subr.bf16.mxu0 %v3460_v1  ;;  %3157 = vmatprep.subr.bf16.mxu1 %v3460_v1 }
 0x1bf   :  { %3144 = vmatpush3.bf16.msra.mxu0 %v3400_v34  ;;  %3158 = vmatpush3.bf16.msra.mxu1 %v3401_v35 }
 0x1c0   :  { %3145 = vmatprep.subr.bf16.mxu0 %v3460_v1  ;;  %3159 = vmatprep.subr.bf16.mxu1 %v3460_v1 }
 0x1c3   :  { %3146 = vmatpush3.bf16.msra.mxu0 %v3402_v36  ;;  %3160 = vmatpush3.bf16.msra.mxu1 %v3403_v37  ;;  %v3421_v37 = vld [vmem:[%s4223_s7 + $0x38] sm:$0xff]  }
 0x1c4   :  { %3147 = vmatprep.subr.bf16.mxu0 %v3460_v1  ;;  %3161 = vmatprep.subr.bf16.mxu1 %v3460_v1 }
 0x1c7   :  { %3148 = vmatpush3.bf16.msra.mxu0 %v1807_v40  ;;  %3162 = vmatpush3.bf16.msra.mxu1 %v1888_v41 }
 0x1c8   :  { %3167 = vmatprep.subr.bf16.mxu1 %v3460_v1  ;;  %2829 = vmatprep.subr.bf16.mxu0 %v3406_v45 }
 0x1ca   :  { %3150 = vmatmul.mubr.msk.bf16.vlgmr.msra.gmra.mrb[12].mxu0 %vm1008_vm4, %v2718_v44  ;;  %3164 = vmatmul.mubr.msk.bf16.vlgmr.msra.gmra.mrb[20].mxu1 %vm1008_vm4, %v2718_v44 }
 0x1cb   :  { %3183 = vmatprep.mubr.msk.bf16.mxu1 %vm3461_vm1, %v3460_v1  ;;  %2830 = vmatpush3.bf16.msra.mxu0 %v3407_v46 }
 0x1cc   :  { %2831 = vmatprep.subr.bf16.mxu0 %v3408_v47 }
 0x1cf   :  { %2832 = vmatpush3.bf16.msra.mxu0 %v3409_v48 }
 0x1d0   :  { %2833 = vmatprep.subr.bf16.mxu0 %v3410_v49  ;;  %v3422_v49 = vld [vmem:[%s4225_s9] sm:$0xff]  }
 0x1d1   :  { %3168 = vmatpush3.bf16.msra.mxu1 %v3422_v49 }
 0x1d2   :  { %3169 = vmatprep.subr.bf16.mxu1 %v3460_v1 }
 0x1d3   :  { %2834 = vmatpush3.bf16.msra.mxu0 %v3411_v50  ;;  %v3423_v50 = vld [vmem:[%s4225_s9 + $0x8] sm:$0xff]  }
 0x1d4   :  { %2835 = vmatprep.subr.bf16.mxu0 %v3412_v51  ;;  %v3424_v51 = vld [vmem:[%s4225_s9 + $0x10] sm:$0xff]  }
 0x1d5   :  { %3170 = vmatpush3.bf16.msra.mxu1 %v3423_v50 }
 0x1d6   :  { %3171 = vmatprep.subr.bf16.mxu1 %v3460_v1 }
 0x1d7   :  { %2836 = vmatpush3.bf16.msra.mxu0 %v3413_v52  ;;  %v3425_v52 = vld [vmem:[%s4225_s9 + $0x18] sm:$0xff]  }
 0x1d8   :  { %2837 = vmatprep.subr.bf16.mxu0 %v3414_v9 }
 0x1d9   :  { %3172 = vmatpush3.bf16.msra.mxu1 %v3424_v51 }
 0x1da   :  { %3173 = vmatprep.subr.bf16.mxu1 %v3460_v1 }
 0x1db   :  { %2838 = vmatpush3.bf16.msra.mxu0 %v3415_v15  ;;  %v3435_v15 = vld [vmem:[%s4227_s11 + $0x28] ss:$0 sps:$4 sm:$0x33]  }
 0x1dc   :  { %2839 = vmatprep.subr.bf16.mxu0 %v3416_v18 }
 0x1dd   :  { %3174 = vmatpush3.bf16.msra.mxu1 %v3425_v52 }
 0x1de   :  { %3175 = vmatprep.subr.bf16.mxu1 %v3460_v1 }
 0x1df   :  { %2840 = vmatpush3.bf16.msra.mxu0 %v3417_v19 }
 0x1e0   :  { %2841 = vmatprep.subr.bf16.mxu0 %v3418_v20 }
 0x1e3   :  { %2842 = vmatpush3.bf16.msra.mxu0 %v3419_v26 }
 0x1e4   :  { %2843 = vmatprep.subr.bf16.mxu0 %v3420_v27 }
 0x1e7   :  { %2844 = vmatpush3.bf16.msra.mxu0 %v3421_v37 }
 0x1e8   :  { %3187 = vmatprep.subr.bf16.mxu0 %v3460_v1 }
 0x29d   :  { %v1843_v53 = vpop.f32.mrb[12].mxu0  ;;  %v1924_v54 = vpop.f32.mrb[20].mxu1 }
 0x29e   :  { %v1935_v55 = vmax.f32 %v1843_v53, %v1924_v54  ;;  %v3151_v56 = vpop.f32.mrb[13].mxu0  ;;  %v3165_v57 = vpop.f32.mrb[21].mxu1  ;;  %v3426_v53 = vld [vmem:[%s4225_s9 + $0x20] sm:$0xff]   ;;  %v3427_v54 = vld [vmem:[%s4225_s9 + $0x28] sm:$0xff]  }
 0x29f   :  { %v1846_v58 = vpop.f32.mrb[14].mxu0  ;;  %v1927_v59 = vpop.f32.mrb[22].mxu1  ;;  %3176 = vmatpush3.bf16.msra.mxu1 %v3426_v53 }
 0x2a0   :  { %1938 = vst.msk [vmem:[#allocation4] sm:$0xff] %vm1937_vm6, %v1935_v55  ;;  %v1936_v60 = vmax.f32 %v1846_v58, %v1927_v59  ;;  %v3152_v61 = vpop.f32.mrb[15].mxu0  ;;  %v3166_v62 = vpop.f32.mrb[23].mxu1  ;;  %3177 = vmatprep.subr.bf16.mxu1 %v3460_v1 }
 0x2a1   :  { %v3428_v61 = vld [vmem:[%s4225_s9 + $0x30] sm:$0xff]   ;;  %v3429_v62 = vld [vmem:[%s4225_s9 + $0x38] ss:$0 sps:$4 sm:$0xff]  }
 0x2a2   :  { %1939 = vst.msk [vmem:[#allocation4 + $0x8] sm:$0xff] %vm1937_vm6, %v1936_v60  ;;  %v2289_v63 = vsel %vm1125_vm3, %v3429_v62, 0 }
 0x2a3   :  { %3178 = vmatpush3.bf16.msra.mxu1 %v3427_v54 }
 0x2a4   :  { %3179 = vmatprep.subr.bf16.mxu1 %v3460_v1 }
 0x2a7   :  { %v1940_v6 = vld [vmem:[#allocation4] ss:$2 sm:$0xf]  ;;  %v1944_v7 = vld [vmem:[#allocation4 + $0x1] ss:$2 sm:$0xf]  ;;  %3180 = vmatpush3.bf16.msra.mxu1 %v3428_v61 }
 0x2a8   :  { %v1947_v8 = vmax.f32 %v1940_v6, %v1944_v7  ;;  %3181 = vmatprep.subr.bf16.mxu1 %v3460_v1  ;;  %v2674_v6 = vld [vmem:[%s4224_s8] ss:$0 sm:$0xff] }
 0x2a9   :  { %v1942_v10 = vld [vmem:[#allocation4 + $0x8] ss:$2 sm:$0xf]  ;;  %v1946_v11 = vld [vmem:[#allocation4 + $0x9] ss:$2 sm:$0xf] }
 0x2aa   :  { %v1948_v12 = vmax.f32 %v1942_v10, %v1946_v11  ;;  %v1956_v13 = vadd.f32 %v2672_v3, %v1947_v8 }
 0x2ab   :  { %3182 = vmatpush3.bf16.msra.mxu1 %v2289_v63 }
 0x2ac   :  { %v1957_v16 = vadd.f32 %v2672_v3, %v1948_v12  ;;  %v1958_v17 = vmax.f32 %v1956_v13, 0.0  ;;  %v3432_v3 = vld [vmem:[%s4227_s11 + $0x10] sm:$0xff]  }
 0x2ae   :  { %v1959_v21 = vmax.f32 %v1957_v16, 0.0  ;;  %v1968_v22 = vrot.slane %v1958_v17, %v1967_v14  ;;  %v2390_v16 = vsel %vm2388_vm14, %v3435_v15, 0  ;;  %v2691_v17 = vld [vmem:[%s4226_s10] ss:$0 sm:$0xff] }
 0x2b0   :  { %v1975_v23 = vrot.slane %v1959_v21, %v1967_v14  ;;  %v1992_v24 = vrot.slane %v1968_v22, 1  ;;  %v2004_v25 = vcombine.high %v1968_v22, %v1968_v22  ;;  %v3434_v14 = vld [vmem:[%s4227_s11 + $0x20] sm:$0xff]   ;;  %s3464_s11 = smov [#allocation6]  }
 0x2b1   :  { %s2439_s14 = sshll.u32 %s3464_s11, 4  ;;  %s2440_s14 = int_to_ptr.vmem [resolvable:$true] %s2439_s14 }
 0x2b2   :  { %v1995_v28 = vsel %vm1981_vm7, %v1975_v23, %v1992_v24  ;;  %v2005_v29 = vcombine.high %v1975_v23, %v1975_v23  ;;  %v2015_v30 = vrot.slane %v2004_v25, 1  ;;  %v1980_v31 = vrot.slane %v1975_v23, 7  ;;  %s3436_s10 = scalar_lea.vmem %s2440_s14, 32  ;;  %p3441_p1 = scmp.lt.s32.totalorder %s2440_s14, %s2440_s14 }
 0x2b3   :  { %v1996_v32 = vsel %vm1983_vm8, %v1975_v23, %v1995_v28  ;;  %p3437_p0 = scmp.ne.s32.totalorder %s2440_s14, %s3436_s10  ;;  %p3442_p2 = scmp.lt.s32.totalorder %s3436_s10, %s3436_s10 }
 0x2b4   :  { %v1997_v33 = vsel %vm1985_vm9, %v1975_v23, %v1996_v32  ;;  %v2018_v34 = vsel %vm1981_vm7, %v2005_v29, %v2015_v30  ;;  %v1982_v35 = vsel %vm1981_vm7, %v1980_v31, %v1968_v22  ;;  %v2008_v36 = vrot.slane %v2005_v29, 7 }
 0x2b5   :  { %v1998_v38 = vsel %vm1987_vm10, %v1975_v23, %v1997_v33  ;;  %v2019_v39 = vsel %vm1983_vm8, %v2005_v29, %v2018_v34  ;;  %v1984_v40 = vsel %vm1983_vm8, %v1980_v31, %v1982_v35  ;;  %p3443_p3 = por %p3442_p2, %p3441_p1 }
 0x2b6   :  { %1999 = vrot.lane.b32.xlu0 %v1998_v38, %s3463_s24  ;;  %v2020_v41 = vsel %vm1985_vm9, %v2005_v29, %v2019_v39  ;;  %v1986_v42 = vsel %vm1985_vm9, %v1980_v31, %v1984_v40  ;;  %v2009_v43 = vsel %vm1981_vm7, %v2008_v36, %v2004_v25 }
 0x2b7   :  { %v1988_v44 = vsel %vm1987_vm10, %v1980_v31, %v1986_v42  ;;  %v2010_v45 = vsel %vm1983_vm8, %v2008_v36, %v2009_v43  ;;  %v2021_v47 = vsel %vm1987_vm10, %v2005_v29, %v2020_v41  ;;  %p3444_p4 = pnand %p3443_p3, %p3437_p0 }
 0x2b8   :  { %1991 = vst.msk [vmem:[#allocation5] sm:$0x3] %vm1990_vm11, %v1988_v44  ;;  %v2011_v46 = vsel %vm1985_vm9, %v2008_v36, %v2010_v45 }
 0x2b9   :  { %v2012_v48 = vsel %vm1987_vm10, %v2008_v36, %v2011_v46 }
 0x2ba   :  { %2022 = vrot.lane.b32.xlu0 %v2021_v47, %s3463_s24  ;;  %2014 = vst.msk [vmem:[#allocation5 + $0x2] sm:$0x3] %vm1990_vm11, %v2012_v48 }
 0x328   :  { %v2000_v55 = vpop.permute.xlu0 %1999 }
 0x329   :  { %2003 = vst.msk [vmem:[#allocation5] sm:$0x3] %vm2002_vm12, %v2000_v55 }
 0x32c   :  { %v2023_v56 = vpop.permute.xlu0 %2022 }
 0x32d   :  { %2025 = vst.msk [vmem:[#allocation5 + $0x2] sm:$0x3] %vm2002_vm12, %v2023_v56 }
 0x334   :  { %v2673_v57 = vld.sshfl [vmem:[#allocation5] sm:$0x33 pattern:$0x76325410] }
 0x335   :  { %v2035_v58 = vcombine.high %v2673_v57, %v2673_v57  ;;  %v2038_v60 = vpack.c.bf16 %v2673_v57, %v2673_v57 }
 0x337   :  { %v2039_v59 = vpack.c.bf16 %v2035_v58, %v2035_v58 }
 0x339   :  { %2207 = vmatprep.mubr.bf16.mxu0 %v2039_v59 }
 0x33a   :  { %2208 = vmatmul.mubr.bf16.vlgmr.msra.gmra.mrb[16].mxu0 %v2038_v60 }
 0x33b   :  { %3199 = vmatprep.mubr.msk.bf16.mxu0 %vm3461_vm1, %v3460_v1  ;;  %3188 = vmatpush3.bf16.msra.mxu0 %v3430_v0 }
 0x33c   :  { %3189 = vmatprep.subr.bf16.mxu0 %v3460_v1 }
 0x33f   :  { %3190 = vmatpush3.bf16.msra.mxu0 %v3431_v2 }
 0x340   :  { %3191 = vmatprep.subr.bf16.mxu0 %v3460_v1 }
 0x343   :  { %3192 = vmatpush3.bf16.msra.mxu0 %v3432_v3 }
 0x344   :  { %3193 = vmatprep.subr.bf16.mxu0 %v3460_v1 }
 0x347   :  { %3194 = vmatpush3.bf16.msra.mxu0 %v3433_v4 }
 0x348   :  { %3195 = vmatprep.subr.bf16.mxu0 %v3460_v1 }
 0x34b   :  { %3196 = vmatpush3.bf16.msra.mxu0 %v3434_v14 }
 0x34c   :  { %3197 = vmatprep.subr.bf16.mxu0 %v3460_v1  ;;  %v2701_v1 = vld [vmem:[%s4228_s12] ss:$0 sm:$0xff] }
 0x34f   :  { %3198 = vmatpush3.bf16.msra.mxu0 %v2390_v16 }
 0x40d   :  { %v2845_v5 = vpop.f32.mrb[16].mxu0 }
 0x40e   :  { %v2846_v7 = vpop.f32.mrb[17].mxu0 }
 0x40f   :  { %v2847_v8 = vadd.f32 %v2846_v7, %v2845_v5  ;;  %v2848_v9 = vpop.f32.mrb[18].mxu0 }
 0x410   :  { %v2849_v10 = vpop.f32.mrb[19].mxu0 }
 0x411   :  { %v2210_v11 = vadd.f32 %v2847_v8, %v2674_v6 }
 0x413   :  { %v2215_v12 = vmax.f32 %v2210_v11, 0.0 }
 0x415   :  { %v2216_v13 = vpack.c.bf16 %v2215_v12, %v2215_v12 }
 0x417   :  { %3184 = vmatmul.mubr.msk.bf16.vlgmr.msra.gmra.mrb[24].mxu1 %vm2284_vm13, %v2216_v13 }
 0x4ea   :  { %v2325_v18 = vpop.f32.mrb[24].mxu1 }
 0x4eb   :  { %v2326_v19 = vadd.f32 %v2691_v17, %v2325_v18  ;;  %v3185_v20 = vpop.f32.mrb[25].mxu1 }
 0x4ec   :  { %v2328_v21 = vpop.f32.mrb[26].mxu1 }
 0x4ed   :  { %v2331_v22 = vmax.f32 %v2326_v19, 0.0  ;;  %v3186_v23 = vpop.f32.mrb[27].mxu1 }
 0x4ef   :  { %v2332_v24 = vpack.c.bf16 %v2331_v22, %v2331_v22 }
 0x4f1   :  { %3200 = vmatmul.mubr.msk.bf16.vlgmr.msra.gmra.mrb[20].mxu0 %vm2384_vm15, %v2332_v24 }
 0x5c4   :  { %v2426_v25 = vpop.f32.mrb[20].mxu0 }
 0x5c5   :  { %v2427_v26 = vadd.f32 %v2701_v1, %v2426_v25  ;;  %v3201_v27 = vpop.f32.mrb[21].mxu0 }
 0x5c6   :  { %v2429_v28 = vpop.f32.mrb[22].mxu0 }
 0x5c7   :  { %2432 = vst [vmem:[#allocation6] sm:$0x3] %v2427_v26  ;;  %v3202_v29 = vpop.f32.mrb[23].mxu0 }
 0x5c8   :  { %3447 = shalt.err (!%p3444_p4)
}
 0x5c9   :  { %s3448_s12 = scalar_lea.hbm %s4229_s13, 32 }
 0x5ca   :  { %p3449_p5 = scmp.ne.s32.totalorder %s4229_s13, %s3448_s12  ;;  %p3452_p6 = scmp.lt.u32.totalorder %s3448_s12, %s4229_s13 }
 0x5cc   :  { %p3454_p7 = pnand %p3452_p6, %p3449_p5 }
 0x5ce   :  { %3457 = shalt.err (!%p3454_p7)
}
 0x5cf   :  { %2442 = dma.vmem_to_hbm [thread:$0]  %s2440_s14, 32, %s4229_s13, [#allocation7]  }
 0x5d0   :  { %3458 = dma.done.wait [#allocation7], 32  }
 0x5d1   :  { %3459 = vsyncadd [#allocation7], 4294967264 }
 0x5d2   :  { %2446 = vsyncpa [#allocation7], 1 }

</bundles_post_ra>
